<compile_context>
chip_gen: v6e
topology: v6e:2x2x1
jax: 0.10.0
libtpu: 0.0.40
codegen_flags: <defaults>
</compile_context>

<pallas_src>
import functools

import jax
import jax.numpy as jnp
from jax import lax
from jax.experimental import pallas as pl
from jax.experimental.pallas import tpu as pltpu


def _round_up(x, m):
    return (x + m - 1) // m * m


def _padded_block_bytes(shape, dtype):
    """VMEM footprint of one buffer of `shape`, with (sublane, lane) tile padding."""
    itemsize = jnp.dtype(dtype).itemsize
    sublane = 8 * max(1, 4 // itemsize)          # 8 for f32, 16 for bf16
    dims = (1, 1) + tuple(int(d) for d in shape)
    lead = 1
    for d in dims[:-2]:
        lead *= d
    return lead * _round_up(dims[-2], sublane) * _round_up(dims[-1], 128) * itemsize


def _vmem_limit(blocks):
    """blocks: list of (shape, dtype). Double-buffered estimate + headroom, clamped."""
    need = 2 * sum(_padded_block_bytes(s, d) for s, d in blocks)
    return int(min(max(2 * need + (8 << 20), 32 << 20), 64 << 20))


def _pick_row_tile(oh, ow, n, max_rows=1024, max_toh=16):
    """Output rows per pass-1 tile: divides OH, bounded rows, >=2 grid steps."""
    cap = max(1, min(max_toh, max_rows // max(ow, 1)))
    divs = [d for d in range(1, oh + 1) if oh % d == 0 and d <= cap]
    toh = max(divs) if divs else 1
    if n * (oh // toh) < 2:                      # keep v7x's second TC busy
        smaller = [d for d in divs if oh // d >= 2]
        if smaller:
            toh = max(smaller)
    return toh


def _pick_bn_tile(spatial, n, max_rows=2048):
    """Rows per pass-2 tile: divides OH*OW and (for the lane-dense transposed
    store) is a multiple of 128 or equal to the full spatial extent."""
    divs = [d for d in range(1, spatial + 1)
            if spatial % d == 0 and (d % 128 == 0 or d == spatial)]
    ok = [d for d in divs if d <= max_rows]
    tm = max(ok) if ok else min(divs)
    if n * (spatial // tm) < 2:
        smaller = [d for d in ok if spatial // d >= 2]
        if smaller:
            tm = max(smaller)
    return tm


# ---------------------------------------------------------------------------
# Kernel 1: fused conv (4 shifted matmuls on s2d input) + bias + LeakyReLU,
#           bf16 y tile out, per-tile f32 BN partial statistics.
# ---------------------------------------------------------------------------
def _conv_lrelu_stats_kernel(xs_ref, w_ref, b_ref, y_ref, sum_ref, sumsq_ref,
                             *, toh, ow, negative_slope):
    # xs_ref:    (1, Hp2, Wp2, 4*Cin) bf16  s2d padded image (resident per batch n)
    # w_ref:     (4, 4*Cin, F)        bf16  k=2,s=1-equivalent weights (resident)
    # b_ref:     (1, F)               f32   conv bias
    # y_ref:     (1, TOH, OW, F)      bf16  conv+bias+LeakyReLU (pre-BN) tile
    # sum_ref:   (1, 1, 1, F)         f32   per-tile per-channel sum   (from f32 acc)
    # sumsq_ref: (1, 1, 1, F)         f32   per-tile per-channel sumsq (from f32 acc)
    j = pl.program_id(1)
    row0 = j * toh
    n_out = w_ref.shape[-1]
    bias = b_ref[...]                                         # (1, F) f32
    s_acc = jnp.zeros((1, n_out), jnp.float32)
    ss_acc = jnp.zeros((1, n_out), jnp.float32)
    for oh_l in range(toh):                                   # static unroll (toh <= 16)
        acc = jnp.zeros((ow, n_out), jnp.float32)
        for k4 in range(4):
            dh, dw = k4 // 2, k4 % 2
            lhs = xs_ref[0, row0 + oh_l + dh, pl.ds(dw, ow), :]   # (OW, 4*Cin) bf16
            acc = acc + jnp.dot(lhs, w_ref[k4],
                                preferred_element_type=jnp.float32)
        yrow = acc + bias                                     # (OW, F) f32
        yrow = jnp.where(yrow > 0, yrow, negative_slope * yrow)   # LeakyReLU(0.01)
        y_ref[0, oh_l] = yrow.astype(y_ref.dtype)             # bf16 store
        s_acc = s_acc + jnp.sum(yrow, axis=0, keepdims=True)
        ss_acc = ss_acc + jnp.sum(yrow * yrow, axis=0, keepdims=True)
    sum_ref[...] = s_acc.reshape(sum_ref.shape)
    sumsq_ref[...] = ss_acc.reshape(sumsq_ref.shape)


# ---------------------------------------------------------------------------
# Kernel 2: BN affine + in-kernel transpose into the flat-NCHW output slab.
# ---------------------------------------------------------------------------
def _bn_apply_transpose_kernel(y_ref, scale_ref, shift_ref, o_ref):
    # y_ref: (1, TM, F) bf16; scale/shift: (1, F) f32; o_ref: (1, F, TM) f32
    y = y_ref[0].astype(jnp.float32)                          # (TM, F)
    out = y * scale_ref[...] + shift_ref[...]                 # (TM, F)
    o_ref[0] = out.T                                          # XLU transpose, (F, TM)


def downsamp_forward(x, conv_w, conv_b, bn_gamma, bn_beta,
                     *, kernel_size=4, stride=2, padding=1,
                     negative_slope=0.01, eps=1e-5):
    """x: (N, C_in, H, W) NCHW. Returns (N, C_out, OH, OW) f32 (training-mode BN)."""
    assert kernel_size == 4 and stride == 2, "fused path implements k=4, s=2"
    n, c_in, h, w = x.shape
    f = conv_w.shape[0]
    hp, wp = h + 2 * padding, w + 2 * padding
    assert hp % 2 == 0 and wp % 2 == 0 and hp >= 4 and wp >= 4
    hp2, wp2 = hp // 2, wp // 2
    oh, ow = hp2 - 1, wp2 - 1
    c4 = 4 * c_in
    m = n * oh * ow

    # --- space-to-depth(2) padded input, bf16: one cheap XLA copy ------------
    xs = jnp.pad(x, ((0, 0), (0, 0), (padding, padding), (padding, padding)))
    xs = xs.reshape(n, c_in, hp2, 2, wp2, 2)                  # (n, c, i, pi, j, pj)
    xs = jnp.transpose(xs, (0, 2, 4, 3, 5, 1))                # (n, i, j, pi, pj, c)
    xs2d = xs.reshape(n, hp2, wp2, c4).astype(jnp.bfloat16)

    # --- weights: k=4,s=2 conv == k=2,s=1 conv on the s2d input --------------
    w2 = conv_w.reshape(f, c_in, 2, 2, 2, 2)                  # (f, c, dh, pi, dw, pj)
    w2 = jnp.transpose(w2, (2, 4, 3, 5, 1, 0))                # (dh, dw, pi, pj, c, f)
    w2 = w2.reshape(4, c4, f).astype(jnp.bfloat16)
    b_row = conv_b.astype(jnp.float32).reshape(1, f)

    # --- pass 1: conv + bias + LeakyReLU (y bf16) + per-tile f32 stats -------
    toh = _pick_row_tile(oh, ow, n)
    ohb = oh // toh
    kern1 = functools.partial(_conv_lrelu_stats_kernel, toh=toh, ow=ow,
                              negative_slope=negative_slope)
    blocks1 = [((1, hp2, wp2, c4), jnp.bfloat16), ((4, c4, f), jnp.bfloat16),
               ((1, f), jnp.float32), ((1, toh, ow, f), jnp.bfloat16),
               ((1, 1, 1, f), jnp.float32), ((1, 1, 1, f), jnp.float32)]
    cost1 = pl.CostEstimate(
        flops=2 * m * (4 * c4) * f, transcendentals=0,
        bytes_accessed=(n * hp2 * wp2 * c4 * 2 + 4 * c4 * f * 2 + f * 4
                        + m * f * 2 + 2 * n * ohb * f * 4))

    y, tile_sum, tile_ssq = pl.pallas_call(
        kern1,
        out_shape=(jax.ShapeDtypeStruct((n, oh, ow, f), jnp.bfloat16),
                   jax.ShapeDtypeStruct((n, ohb, 1, f), jnp.float32),
                   jax.ShapeDtypeStruct((n, ohb, 1, f), jnp.float32)),
        grid=(n, ohb),
        in_specs=[
            pl.BlockSpec((1, hp2, wp2, c4), lambda i, j: (i, 0, 0, 0)),
            pl.BlockSpec((4, c4, f), lambda i, j: (0, 0, 0)),
            pl.BlockSpec((1, f), lambda i, j: (0, 0)),
        ],
        out_specs=(
            pl.BlockSpec((1, toh, ow, f), lambda i, j: (i, j, 0, 0)),
            pl.BlockSpec((1, 1, 1, f), lambda i, j: (i, j, 0, 0)),
            pl.BlockSpec((1, 1, 1, f), lambda i, j: (i, j, 0, 0)),
        ),
        compiler_params=pltpu.CompilerParams(
            dimension_semantics=("parallel", "parallel"),
            vmem_limit_bytes=_vmem_limit(blocks1)),
        cost_estimate=cost1,
    )(xs2d, w2, b_row)

    # --- tiny JAX combine: global batch mean / biased var -> scale & shift ---
    sums = tile_sum.reshape(-1, f).sum(axis=0)
    ssqs = tile_ssq.reshape(-1, f).sum(axis=0)
    mean = sums / m
    var = jnp.maximum(ssqs / m - mean * mean, 0.0)            # biased (training BN)
    scale = (bn_gamma.astype(jnp.float32) * lax.rsqrt(var + eps)).reshape(1, f)
    shift = (bn_beta.astype(jnp.float32) - mean * scale[0]).reshape(1, f)

    # --- pass 2: y * scale + shift, transposed into flat-NCHW output ---------
    spatial = oh * ow
    tm2 = _pick_bn_tile(spatial, n)
    nt2 = spatial // tm2
    y_flat = y.reshape(n, spatial, f)                         # metadata-only
    blocks2 = [((1, tm2, f), jnp.bfloat16), ((1, f), jnp.float32),
               ((1, f), jnp.float32), ((1, f, tm2), jnp.float32)]
    cost2 = pl.CostEstimate(flops=2 * m * f, transcendentals=0,
                            bytes_accessed=m * f * 2 + m * f * 4 + 2 * f * 4)

    out = pl.pallas_call(
        _bn_apply_transpose_kernel,
        out_shape=jax.ShapeDtypeStruct((n, f, spatial), jnp.float32),
        grid=(n, nt2),
        in_specs=[
            pl.BlockSpec((1, tm2, f), lambda i, j: (i, j, 0)),
            pl.BlockSpec((1, f), lambda i, j: (0, 0)),
            pl.BlockSpec((1, f), lambda i, j: (0, 0)),
        ],
        out_specs=pl.BlockSpec((1, f, tm2), lambda i, j: (i, 0, j)),
        compiler_params=pltpu.CompilerParams(
            dimension_semantics=("parallel", "parallel"),
            vmem_limit_bytes=_vmem_limit(blocks2)),
        cost_estimate=cost2,
    )(y_flat, scale, shift)

    return out.reshape(n, f, oh, ow)                          # metadata-only


if __name__ == "__main__":
    N, C_IN, H, W = 2, 4, 16, 16
    C_OUT = 8
    KS, STRIDE, PAD = 4, 2, 1

    key = jax.random.PRNGKey(0)
    kx, kw, kb, kg, kbe = jax.random.split(key, 5)

    x = jax.random.normal(kx, (N, C_IN, H, W), dtype=jnp.float32)
    conv_w = jax.random.normal(kw, (C_OUT, C_IN, KS, KS), dtype=jnp.float32) * 0.1
    conv_b = jax.random.normal(kb, (C_OUT,), dtype=jnp.float32) * 0.1
    bn_gamma = 1.0 + 0.1 * jax.random.normal(kg, (C_OUT,), dtype=jnp.float32)
    bn_beta = 0.1 * jax.random.normal(kbe, (C_OUT,), dtype=jnp.float32)

    fwd = jax.jit(functools.partial(downsamp_forward, kernel_size=KS,
                                    stride=STRIDE, padding=PAD))
    out = jax.block_until_ready(fwd(x, conv_w, conv_b, bn_gamma, bn_beta))

    assert out.shape == (N, C_OUT, H // 2, W // 2), out.shape
    assert out.dtype == jnp.float32

    # Pure-JAX reference: Conv2d -> LeakyReLU(0.01) -> training-mode BatchNorm2d.
    ref = lax.conv_general_dilated(x, conv_w, window_strides=(STRIDE, STRIDE),
                                   padding=((PAD, PAD), (PAD, PAD)),
                                   dimension_numbers=("NCHW", "OIHW", "NCHW"))
    ref = ref + conv_b.reshape(1, -1, 1, 1)
    ref = jnp.where(ref > 0, ref, 0.01 * ref)
    mu = ref.mean(axis=(0, 2, 3), keepdims=True)
    var = ref.var(axis=(0, 2, 3), keepdims=True)
    ref = (ref - mu) * lax.rsqrt(var + 1e-5) * bn_gamma.reshape(1, -1, 1, 1) \
        + bn_beta.reshape(1, -1, 1, 1)
    err = float(jnp.max(jnp.abs(out - ref)))
    assert err < 5e-2, f"max abs err {err}"

    print("KERNEL_OK")
</pallas_src>

<mosaic_0001>
module attributes {stable_mosaic.version = 11 : i64} {
  func.func @_conv_lrelu_stats_kernel(%arg0: i32, %arg1: i32, %arg2: memref<1x9x9x16xbf16, #tpu.memory_space<vmem>>, %arg3: memref<4x16x8xbf16, #tpu.memory_space<vmem>>, %arg4: memref<1x8xf32, #tpu.memory_space<vmem>>, %arg5: memref<1x8x8x8xbf16, #tpu.memory_space<vmem>>, %arg6: memref<1x1x1x8xf32, #tpu.memory_space<vmem>>, %arg7: memref<1x1x1x8xf32, #tpu.memory_space<vmem>>) attributes {dimension_semantics = [#tpu.dimension_semantics<parallel>, #tpu.dimension_semantics<parallel>], iteration_bounds = array<i64: 2, 1>, scalar_prefetch = 0 : i64, scratch_operands = 0 : i64, tpu.core_type = #tpu.core_type<tc>, window_params = [{transform_indices = @transform_0, window_bounds = array<i64: 1, 9, 9, 16>}, {pipeline_mode = #tpu.pipeline_mode<synchronous>, transform_indices = @transform_1, window_bounds = array<i64: 4, 16, 8>}, {pipeline_mode = #tpu.pipeline_mode<synchronous>, transform_indices = @transform_2, window_bounds = array<i64: 1, 8>}, {transform_indices = @transform_3, window_bounds = array<i64: 1, 8, 8, 8>}, {transform_indices = @transform_4, window_bounds = array<i64: 1, 1, 1, 8>}, {transform_indices = @transform_5, window_bounds = array<i64: 1, 1, 1, 8>}]} {
    %c8_i32 = arith.constant 8 : i32
    %0 = arith.muli %arg1, %c8_i32 : i32
    %c0 = arith.constant 0 : index
    %c0_0 = arith.constant 0 : index
    %1 = vector.load %arg4[%c0, %c0_0] : memref<1x8xf32, #tpu.memory_space<vmem>>, vector<1x8xf32>
    %cst = arith.constant 0.000000e+00 : f32
    %2 = vector.broadcast %cst : f32 to vector<1x8xf32>
    %cst_1 = arith.constant 0.000000e+00 : f32
    %3 = vector.broadcast %cst_1 : f32 to vector<1x8xf32>
    %cst_2 = arith.constant 0.000000e+00 : f32
    %4 = vector.broadcast %cst_2 : f32 to vector<8x8xf32>
    %c0_i32 = arith.constant 0 : i32
    %5 = arith.addi %0, %c0_i32 : i32
    %c0_i32_3 = arith.constant 0 : i32
    %6 = arith.addi %5, %c0_i32_3 : i32
    %c0_4 = arith.constant 0 : index
    %7 = arith.index_cast %6 : i32 to index
    %c0_5 = arith.constant 0 : index
    %c0_6 = arith.constant 0 : index
    %8 = vector.load %arg2[%c0_4, %7, %c0_5, %c0_6] : memref<1x9x9x16xbf16, #tpu.memory_space<vmem>>, vector<1x1x8x16xbf16>
    %9 = vector.shape_cast %8 : vector<1x1x8x16xbf16> to vector<8x16xbf16>
    %c0_7 = arith.constant 0 : index
    %c0_8 = arith.constant 0 : index
    %c0_9 = arith.constant 0 : index
    %10 = vector.load %arg3[%c0_7, %c0_8, %c0_9] : memref<4x16x8xbf16, #tpu.memory_space<vmem>>, vector<1x16x8xbf16>
    %11 = vector.shape_cast %10 : vector<1x16x8xbf16> to vector<16x8xbf16>
    %cst_10 = arith.constant dense<0.000000e+00> : vector<8x8xf32>
    %12 = tpu.matmul %9, %11, %cst_10 {dimension_numbers = #tpu.dot_dimension_numbers<[1], [0], [0], [1], [0, 0, 1, 1], [], []>} : vector<8x16xbf16>, vector<16x8xbf16>, vector<8x8xf32> -> vector<8x8xf32>
    %13 = arith.addf %4, %12 : vector<8x8xf32>
    %c0_i32_11 = arith.constant 0 : i32
    %14 = arith.addi %0, %c0_i32_11 : i32
    %c0_i32_12 = arith.constant 0 : i32
    %15 = arith.addi %14, %c0_i32_12 : i32
    %c0_13 = arith.constant 0 : index
    %16 = arith.index_cast %15 : i32 to index
    %c1 = arith.constant 1 : index
    %c0_14 = arith.constant 0 : index
    %17 = vector.load %arg2[%c0_13, %16, %c1, %c0_14] : memref<1x9x9x16xbf16, #tpu.memory_space<vmem>>, vector<1x1x8x16xbf16>
    %18 = vector.shape_cast %17 : vector<1x1x8x16xbf16> to vector<8x16xbf16>
    %c1_15 = arith.constant 1 : index
    %c0_16 = arith.constant 0 : index
    %c0_17 = arith.constant 0 : index
    %19 = vector.load %arg3[%c1_15, %c0_16, %c0_17] : memref<4x16x8xbf16, #tpu.memory_space<vmem>>, vector<1x16x8xbf16>
    %20 = vector.shape_cast %19 : vector<1x16x8xbf16> to vector<16x8xbf16>
    %cst_18 = arith.constant dense<0.000000e+00> : vector<8x8xf32>
    %21 = tpu.matmul %18, %20, %cst_18 {dimension_numbers = #tpu.dot_dimension_numbers<[1], [0], [0], [1], [0, 0, 1, 1], [], []>} : vector<8x16xbf16>, vector<16x8xbf16>, vector<8x8xf32> -> vector<8x8xf32>
    %22 = arith.addf %13, %21 : vector<8x8xf32>
    %c0_i32_19 = arith.constant 0 : i32
    %23 = arith.addi %0, %c0_i32_19 : i32
    %c1_i32 = arith.constant 1 : i32
    %24 = arith.addi %23, %c1_i32 : i32
    %c0_20 = arith.constant 0 : index
    %25 = arith.index_cast %24 : i32 to index
    %c0_21 = arith.constant 0 : index
    %c0_22 = arith.constant 0 : index
    %26 = vector.load %arg2[%c0_20, %25, %c0_21, %c0_22] : memref<1x9x9x16xbf16, #tpu.memory_space<vmem>>, vector<1x1x8x16xbf16>
    %27 = vector.shape_cast %26 : vector<1x1x8x16xbf16> to vector<8x16xbf16>
    %c2 = arith.constant 2 : index
    %c0_23 = arith.constant 0 : index
    %c0_24 = arith.constant 0 : index
    %28 = vector.load %arg3[%c2, %c0_23, %c0_24] : memref<4x16x8xbf16, #tpu.memory_space<vmem>>, vector<1x16x8xbf16>
    %29 = vector.shape_cast %28 : vector<1x16x8xbf16> to vector<16x8xbf16>
    %cst_25 = arith.constant dense<0.000000e+00> : vector<8x8xf32>
    %30 = tpu.matmul %27, %29, %cst_25 {dimension_numbers = #tpu.dot_dimension_numbers<[1], [0], [0], [1], [0, 0, 1, 1], [], []>} : vector<8x16xbf16>, vector<16x8xbf16>, vector<8x8xf32> -> vector<8x8xf32>
    %31 = arith.addf %22, %30 : vector<8x8xf32>
    %c0_i32_26 = arith.constant 0 : i32
    %32 = arith.addi %0, %c0_i32_26 : i32
    %c1_i32_27 = arith.constant 1 : i32
    %33 = arith.addi %32, %c1_i32_27 : i32
    %c0_28 = arith.constant 0 : index
    %34 = arith.index_cast %33 : i32 to index
    %c1_29 = arith.constant 1 : index
    %c0_30 = arith.constant 0 : index
    %35 = vector.load %arg2[%c0_28, %34, %c1_29, %c0_30] : memref<1x9x9x16xbf16, #tpu.memory_space<vmem>>, vector<1x1x8x16xbf16>
    %36 = vector.shape_cast %35 : vector<1x1x8x16xbf16> to vector<8x16xbf16>
    %c3 = arith.constant 3 : index
    %c0_31 = arith.constant 0 : index
    %c0_32 = arith.constant 0 : index
    %37 = vector.load %arg3[%c3, %c0_31, %c0_32] : memref<4x16x8xbf16, #tpu.memory_space<vmem>>, vector<1x16x8xbf16>
    %38 = vector.shape_cast %37 : vector<1x16x8xbf16> to vector<16x8xbf16>
    %cst_33 = arith.constant dense<0.000000e+00> : vector<8x8xf32>
    %39 = tpu.matmul %36, %38, %cst_33 {dimension_numbers = #tpu.dot_dimension_numbers<[1], [0], [0], [1], [0, 0, 1, 1], [], []>} : vector<8x16xbf16>, vector<16x8xbf16>, vector<8x8xf32> -> vector<8x8xf32>
    %40 = arith.addf %31, %39 : vector<8x8xf32>
    %41 = vector.broadcast %1 : vector<1x8xf32> to vector<8x8xf32>
    %42 = arith.addf %40, %41 : vector<8x8xf32>
    %cst_34 = arith.constant 0.000000e+00 : f32
    %43 = vector.broadcast %cst_34 : f32 to vector<8x8xf32>
    %44 = arith.cmpf ogt, %42, %43 : vector<8x8xf32>
    %cst_35 = arith.constant 0.00999999977 : f32
    %45 = vector.broadcast %cst_35 : f32 to vector<8x8xf32>
    %46 = arith.mulf %45, %42 : vector<8x8xf32>
    %47 = arith.select %44, %42, %46 : vector<8x8xi1>, vector<8x8xf32>
    %48 = arith.truncf %47 : vector<8x8xf32> to vector<8x8xbf16>
    %c0_36 = arith.constant 0 : index
    %c0_37 = arith.constant 0 : index
    %c0_38 = arith.constant 0 : index
    %c0_39 = arith.constant 0 : index
    %49 = vector.load %arg5[%c0_36, %c0_37, %c0_38, %c0_39] : memref<1x8x8x8xbf16, #tpu.memory_space<vmem>>, vector<1x1x8x8xbf16>
    %50 = vector.shape_cast %49 : vector<1x1x8x8xbf16> to vector<8x8xbf16>
    %51 = vector.shape_cast %48 : vector<8x8xbf16> to vector<1x1x8x8xbf16>
    tpu.vector_store %arg5[%c0_36, %c0_37, %c0_38, %c0_39], %51 {strides = array<i32>} : memref<1x8x8x8xbf16, #tpu.memory_space<vmem>>, vector<1x1x8x8xbf16>,
    %cst_40 = arith.constant dense<0.000000e+00> : vector<8xf32>
    %52 = vector.multi_reduction <add>, %47, %cst_40 [0] : vector<8x8xf32> to vector<8xf32>
    %53 = vector.shape_cast %52 : vector<8xf32> to vector<1x8xf32>
    %54 = arith.addf %2, %53 : vector<1x8xf32>
    %55 = arith.mulf %47, %47 : vector<8x8xf32>
    %cst_41 = arith.constant dense<0.000000e+00> : vector<8xf32>
    %56 = vector.multi_reduction <add>, %55, %cst_41 [0] : vector<8x8xf32> to vector<8xf32>
    %57 = vector.shape_cast %56 : vector<8xf32> to vector<1x8xf32>
    %58 = arith.addf %3, %57 : vector<1x8xf32>
    %cst_42 = arith.constant 0.000000e+00 : f32
    %59 = vector.broadcast %cst_42 : f32 to vector<8x8xf32>
    %c1_i32_43 = arith.constant 1 : i32
    %60 = arith.addi %0, %c1_i32_43 : i32
    %c0_i32_44 = arith.constant 0 : i32
    %61 = arith.addi %60, %c0_i32_44 : i32
    %c0_45 = arith.constant 0 : index
    %62 = arith.index_cast %61 : i32 to index
    %c0_46 = arith.constant 0 : index
    %c0_47 = arith.constant 0 : index
    %63 = vector.load %arg2[%c0_45, %62, %c0_46, %c0_47] : memref<1x9x9x16xbf16, #tpu.memory_space<vmem>>, vector<1x1x8x16xbf16>
    %64 = vector.shape_cast %63 : vector<1x1x8x16xbf16> to vector<8x16xbf16>
    %c0_48 = arith.constant 0 : index
    %c0_49 = arith.constant 0 : index
    %c0_50 = arith.constant 0 : index
    %65 = vector.load %arg3[%c0_48, %c0_49, %c0_50] : memref<4x16x8xbf16, #tpu.memory_space<vmem>>, vector<1x16x8xbf16>
    %66 = vector.shape_cast %65 : vector<1x16x8xbf16> to vector<16x8xbf16>
    %cst_51 = arith.constant dense<0.000000e+00> : vector<8x8xf32>
    %67 = tpu.matmul %64, %66, %cst_51 {dimension_numbers = #tpu.dot_dimension_numbers<[1], [0], [0], [1], [0, 0, 1, 1], [], []>} : vector<8x16xbf16>, vector<16x8xbf16>, vector<8x8xf32> -> vector<8x8xf32>
    %68 = arith.addf %59, %67 : vector<8x8xf32>
    %c1_i32_52 = arith.constant 1 : i32
    %69 = arith.addi %0, %c1_i32_52 : i32
    %c0_i32_53 = arith.constant 0 : i32
    %70 = arith.addi %69, %c0_i32_53 : i32
    %c0_54 = arith.constant 0 : index
    %71 = arith.index_cast %70 : i32 to index
    %c1_55 = arith.constant 1 : index
    %c0_56 = arith.constant 0 : index
    %72 = vector.load %arg2[%c0_54, %71, %c1_55, %c0_56] : memref<1x9x9x16xbf16, #tpu.memory_space<vmem>>, vector<1x1x8x16xbf16>
    %73 = vector.shape_cast %72 : vector<1x1x8x16xbf16> to vector<8x16xbf16>
    %c1_57 = arith.constant 1 : index
    %c0_58 = arith.constant 0 : index
    %c0_59 = arith.constant 0 : index
    %74 = vector.load %arg3[%c1_57, %c0_58, %c0_59] : memref<4x16x8xbf16, #tpu.memory_space<vmem>>, vector<1x16x8xbf16>
    %75 = vector.shape_cast %74 : vector<1x16x8xbf16> to vector<16x8xbf16>
    %cst_60 = arith.constant dense<0.000000e+00> : vector<8x8xf32>
    %76 = tpu.matmul %73, %75, %cst_60 {dimension_numbers = #tpu.dot_dimension_numbers<[1], [0], [0], [1], [0, 0, 1, 1], [], []>} : vector<8x16xbf16>, vector<16x8xbf16>, vector<8x8xf32> -> vector<8x8xf32>
    %77 = arith.addf %68, %76 : vector<8x8xf32>
    %c1_i32_61 = arith.constant 1 : i32
    %78 = arith.addi %0, %c1_i32_61 : i32
    %c1_i32_62 = arith.constant 1 : i32
    %79 = arith.addi %78, %c1_i32_62 : i32
    %c0_63 = arith.constant 0 : index
    %80 = arith.index_cast %79 : i32 to index
    %c0_64 = arith.constant 0 : index
    %c0_65 = arith.constant 0 : index
    %81 = vector.load %arg2[%c0_63, %80, %c0_64, %c0_65] : memref<1x9x9x16xbf16, #tpu.memory_space<vmem>>, vector<1x1x8x16xbf16>
    %82 = vector.shape_cast %81 : vector<1x1x8x16xbf16> to vector<8x16xbf16>
    %c2_66 = arith.constant 2 : index
    %c0_67 = arith.constant 0 : index
    %c0_68 = arith.constant 0 : index
    %83 = vector.load %arg3[%c2_66, %c0_67, %c0_68] : memref<4x16x8xbf16, #tpu.memory_space<vmem>>, vector<1x16x8xbf16>
    %84 = vector.shape_cast %83 : vector<1x16x8xbf16> to vector<16x8xbf16>
    %cst_69 = arith.constant dense<0.000000e+00> : vector<8x8xf32>
    %85 = tpu.matmul %82, %84, %cst_69 {dimension_numbers = #tpu.dot_dimension_numbers<[1], [0], [0], [1], [0, 0, 1, 1], [], []>} : vector<8x16xbf16>, vector<16x8xbf16>, vector<8x8xf32> -> vector<8x8xf32>
    %86 = arith.addf %77, %85 : vector<8x8xf32>
    %c1_i32_70 = arith.constant 1 : i32
    %87 = arith.addi %0, %c1_i32_70 : i32
    %c1_i32_71 = arith.constant 1 : i32
    %88 = arith.addi %87, %c1_i32_71 : i32
    %c0_72 = arith.constant 0 : index
    %89 = arith.index_cast %88 : i32 to index
    %c1_73 = arith.constant 1 : index
    %c0_74 = arith.constant 0 : index
    %90 = vector.load %arg2[%c0_72, %89, %c1_73, %c0_74] : memref<1x9x9x16xbf16, #tpu.memory_space<vmem>>, vector<1x1x8x16xbf16>
    %91 = vector.shape_cast %90 : vector<1x1x8x16xbf16> to vector<8x16xbf16>
    %c3_75 = arith.constant 3 : index
    %c0_76 = arith.constant 0 : index
    %c0_77 = arith.constant 0 : index
    %92 = vector.load %arg3[%c3_75, %c0_76, %c0_77] : memref<4x16x8xbf16, #tpu.memory_space<vmem>>, vector<1x16x8xbf16>
    %93 = vector.shape_cast %92 : vector<1x16x8xbf16> to vector<16x8xbf16>
    %cst_78 = arith.constant dense<0.000000e+00> : vector<8x8xf32>
    %94 = tpu.matmul %91, %93, %cst_78 {dimension_numbers = #tpu.dot_dimension_numbers<[1], [0], [0], [1], [0, 0, 1, 1], [], []>} : vector<8x16xbf16>, vector<16x8xbf16>, vector<8x8xf32> -> vector<8x8xf32>
    %95 = arith.addf %86, %94 : vector<8x8xf32>
    %96 = vector.broadcast %1 : vector<1x8xf32> to vector<8x8xf32>
    %97 = arith.addf %95, %96 : vector<8x8xf32>
    %cst_79 = arith.constant 0.000000e+00 : f32
    %98 = vector.broadcast %cst_79 : f32 to vector<8x8xf32>
    %99 = arith.cmpf ogt, %97, %98 : vector<8x8xf32>
    %cst_80 = arith.constant 0.00999999977 : f32
    %100 = vector.broadcast %cst_80 : f32 to vector<8x8xf32>
    %101 = arith.mulf %100, %97 : vector<8x8xf32>
    %102 = arith.select %99, %97, %101 : vector<8x8xi1>, vector<8x8xf32>
    %103 = arith.truncf %102 : vector<8x8xf32> to vector<8x8xbf16>
    %c0_81 = arith.constant 0 : index
    %c1_82 = arith.constant 1 : index
    %c0_83 = arith.constant 0 : index
    %c0_84 = arith.constant 0 : index
    %104 = vector.load %arg5[%c0_81, %c1_82, %c0_83, %c0_84] : memref<1x8x8x8xbf16, #tpu.memory_space<vmem>>, vector<1x1x8x8xbf16>
    %105 = vector.shape_cast %104 : vector<1x1x8x8xbf16> to vector<8x8xbf16>
    %106 = vector.shape_cast %103 : vector<8x8xbf16> to vector<1x1x8x8xbf16>
    tpu.vector_store %arg5[%c0_81, %c1_82, %c0_83, %c0_84], %106 {strides = array<i32>} : memref<1x8x8x8xbf16, #tpu.memory_space<vmem>>, vector<1x1x8x8xbf16>,
    %cst_85 = arith.constant dense<0.000000e+00> : vector<8xf32>
    %107 = vector.multi_reduction <add>, %102, %cst_85 [0] : vector<8x8xf32> to vector<8xf32>
    %108 = vector.shape_cast %107 : vector<8xf32> to vector<1x8xf32>
    %109 = arith.addf %54, %108 : vector<1x8xf32>
    %110 = arith.mulf %102, %102 : vector<8x8xf32>
    %cst_86 = arith.constant dense<0.000000e+00> : vector<8xf32>
    %111 = vector.multi_reduction <add>, %110, %cst_86 [0] : vector<8x8xf32> to vector<8xf32>
    %112 = vector.shape_cast %111 : vector<8xf32> to vector<1x8xf32>
    %113 = arith.addf %58, %112 : vector<1x8xf32>
    %cst_87 = arith.constant 0.000000e+00 : f32
    %114 = vector.broadcast %cst_87 : f32 to vector<8x8xf32>
    %c2_i32 = arith.constant 2 : i32
    %115 = arith.addi %0, %c2_i32 : i32
    %c0_i32_88 = arith.constant 0 : i32
    %116 = arith.addi %115, %c0_i32_88 : i32
    %c0_89 = arith.constant 0 : index
    %117 = arith.index_cast %116 : i32 to index
    %c0_90 = arith.constant 0 : index
    %c0_91 = arith.constant 0 : index
    %118 = vector.load %arg2[%c0_89, %117, %c0_90, %c0_91] : memref<1x9x9x16xbf16, #tpu.memory_space<vmem>>, vector<1x1x8x16xbf16>
    %119 = vector.shape_cast %118 : vector<1x1x8x16xbf16> to vector<8x16xbf16>
    %c0_92 = arith.constant 0 : index
    %c0_93 = arith.constant 0 : index
    %c0_94 = arith.constant 0 : index
    %120 = vector.load %arg3[%c0_92, %c0_93, %c0_94] : memref<4x16x8xbf16, #tpu.memory_space<vmem>>, vector<1x16x8xbf16>
    %121 = vector.shape_cast %120 : vector<1x16x8xbf16> to vector<16x8xbf16>
    %cst_95 = arith.constant dense<0.000000e+00> : vector<8x8xf32>
    %122 = tpu.matmul %119, %121, %cst_95 {dimension_numbers = #tpu.dot_dimension_numbers<[1], [0], [0], [1], [0, 0, 1, 1], [], []>} : vector<8x16xbf16>, vector<16x8xbf16>, vector<8x8xf32> -> vector<8x8xf32>
    %123 = arith.addf %114, %122 : vector<8x8xf32>
    %c2_i32_96 = arith.constant 2 : i32
    %124 = arith.addi %0, %c2_i32_96 : i32
    %c0_i32_97 = arith.constant 0 : i32
    %125 = arith.addi %124, %c0_i32_97 : i32
    %c0_98 = arith.constant 0 : index
    %126 = arith.index_cast %125 : i32 to index
    %c1_99 = arith.constant 1 : index
    %c0_100 = arith.constant 0 : index
    %127 = vector.load %arg2[%c0_98, %126, %c1_99, %c0_100] : memref<1x9x9x16xbf16, #tpu.memory_space<vmem>>, vector<1x1x8x16xbf16>
    %128 = vector.shape_cast %127 : vector<1x1x8x16xbf16> to vector<8x16xbf16>
    %c1_101 = arith.constant 1 : index
    %c0_102 = arith.constant 0 : index
    %c0_103 = arith.constant 0 : index
    %129 = vector.load %arg3[%c1_101, %c0_102, %c0_103] : memref<4x16x8xbf16, #tpu.memory_space<vmem>>, vector<1x16x8xbf16>
    %130 = vector.shape_cast %129 : vector<1x16x8xbf16> to vector<16x8xbf16>
    %cst_104 = arith.constant dense<0.000000e+00> : vector<8x8xf32>
    %131 = tpu.matmul %128, %130, %cst_104 {dimension_numbers = #tpu.dot_dimension_numbers<[1], [0], [0], [1], [0, 0, 1, 1], [], []>} : vector<8x16xbf16>, vector<16x8xbf16>, vector<8x8xf32> -> vector<8x8xf32>
    %132 = arith.addf %123, %131 : vector<8x8xf32>
    %c2_i32_105 = arith.constant 2 : i32
    %133 = arith.addi %0, %c2_i32_105 : i32
    %c1_i32_106 = arith.constant 1 : i32
    %134 = arith.addi %133, %c1_i32_106 : i32
    %c0_107 = arith.constant 0 : index
    %135 = arith.index_cast %134 : i32 to index
    %c0_108 = arith.constant 0 : index
    %c0_109 = arith.constant 0 : index
    %136 = vector.load %arg2[%c0_107, %135, %c0_108, %c0_109] : memref<1x9x9x16xbf16, #tpu.memory_space<vmem>>, vector<1x1x8x16xbf16>
    %137 = vector.shape_cast %136 : vector<1x1x8x16xbf16> to vector<8x16xbf16>
    %c2_110 = arith.constant 2 : index
    %c0_111 = arith.constant 0 : index
    %c0_112 = arith.constant 0 : index
    %138 = vector.load %arg3[%c2_110, %c0_111, %c0_112] : memref<4x16x8xbf16, #tpu.memory_space<vmem>>, vector<1x16x8xbf16>
    %139 = vector.shape_cast %138 : vector<1x16x8xbf16> to vector<16x8xbf16>
    %cst_113 = arith.constant dense<0.000000e+00> : vector<8x8xf32>
    %140 = tpu.matmul %137, %139, %cst_113 {dimension_numbers = #tpu.dot_dimension_numbers<[1], [0], [0], [1], [0, 0, 1, 1], [], []>} : vector<8x16xbf16>, vector<16x8xbf16>, vector<8x8xf32> -> vector<8x8xf32>
    %141 = arith.addf %132, %140 : vector<8x8xf32>
    %c2_i32_114 = arith.constant 2 : i32
    %142 = arith.addi %0, %c2_i32_114 : i32
    %c1_i32_115 = arith.constant 1 : i32
    %143 = arith.addi %142, %c1_i32_115 : i32
    %c0_116 = arith.constant 0 : index
    %144 = arith.index_cast %143 : i32 to index
    %c1_117 = arith.constant 1 : index
    %c0_118 = arith.constant 0 : index
    %145 = vector.load %arg2[%c0_116, %144, %c1_117, %c0_118] : memref<1x9x9x16xbf16, #tpu.memory_space<vmem>>, vector<1x1x8x16xbf16>
    %146 = vector.shape_cast %145 : vector<1x1x8x16xbf16> to vector<8x16xbf16>
    %c3_119 = arith.constant 3 : index
    %c0_120 = arith.constant 0 : index
    %c0_121 = arith.constant 0 : index
    %147 = vector.load %arg3[%c3_119, %c0_120, %c0_121] : memref<4x16x8xbf16, #tpu.memory_space<vmem>>, vector<1x16x8xbf16>
    %148 = vector.shape_cast %147 : vector<1x16x8xbf16> to vector<16x8xbf16>
    %cst_122 = arith.constant dense<0.000000e+00> : vector<8x8xf32>
    %149 = tpu.matmul %146, %148, %cst_122 {dimension_numbers = #tpu.dot_dimension_numbers<[1], [0], [0], [1], [0, 0, 1, 1], [], []>} : vector<8x16xbf16>, vector<16x8xbf16>, vector<8x8xf32> -> vector<8x8xf32>
    %150 = arith.addf %141, %149 : vector<8x8xf32>
    %151 = vector.broadcast %1 : vector<1x8xf32> to vector<8x8xf32>
    %152 = arith.addf %150, %151 : vector<8x8xf32>
    %cst_123 = arith.constant 0.000000e+00 : f32
    %153 = vector.broadcast %cst_123 : f32 to vector<8x8xf32>
    %154 = arith.cmpf ogt, %152, %153 : vector<8x8xf32>
    %cst_124 = arith.constant 0.00999999977 : f32
    %155 = vector.broadcast %cst_124 : f32 to vector<8x8xf32>
    %156 = arith.mulf %155, %152 : vector<8x8xf32>
    %157 = arith.select %154, %152, %156 : vector<8x8xi1>, vector<8x8xf32>
    %158 = arith.truncf %157 : vector<8x8xf32> to vector<8x8xbf16>
    %c0_125 = arith.constant 0 : index
    %c2_126 = arith.constant 2 : index
    %c0_127 = arith.constant 0 : index
    %c0_128 = arith.constant 0 : index
    %159 = vector.load %arg5[%c0_125, %c2_126, %c0_127, %c0_128] : memref<1x8x8x8xbf16, #tpu.memory_space<vmem>>, vector<1x1x8x8xbf16>
    %160 = vector.shape_cast %159 : vector<1x1x8x8xbf16> to vector<8x8xbf16>
    %161 = vector.shape_cast %158 : vector<8x8xbf16> to vector<1x1x8x8xbf16>
    tpu.vector_store %arg5[%c0_125, %c2_126, %c0_127, %c0_128], %161 {strides = array<i32>} : memref<1x8x8x8xbf16, #tpu.memory_space<vmem>>, vector<1x1x8x8xbf16>,
    %cst_129 = arith.constant dense<0.000000e+00> : vector<8xf32>
    %162 = vector.multi_reduction <add>, %157, %cst_129 [0] : vector<8x8xf32> to vector<8xf32>
    %163 = vector.shape_cast %162 : vector<8xf32> to vector<1x8xf32>
    %164 = arith.addf %109, %163 : vector<1x8xf32>
    %165 = arith.mulf %157, %157 : vector<8x8xf32>
    %cst_130 = arith.constant dense<0.000000e+00> : vector<8xf32>
    %166 = vector.multi_reduction <add>, %165, %cst_130 [0] : vector<8x8xf32> to vector<8xf32>
    %167 = vector.shape_cast %166 : vector<8xf32> to vector<1x8xf32>
    %168 = arith.addf %113, %167 : vector<1x8xf32>
    %cst_131 = arith.constant 0.000000e+00 : f32
    %169 = vector.broadcast %cst_131 : f32 to vector<8x8xf32>
    %c3_i32 = arith.constant 3 : i32
    %170 = arith.addi %0, %c3_i32 : i32
    %c0_i32_132 = arith.constant 0 : i32
    %171 = arith.addi %170, %c0_i32_132 : i32
    %c0_133 = arith.constant 0 : index
    %172 = arith.index_cast %171 : i32 to index
    %c0_134 = arith.constant 0 : index
    %c0_135 = arith.constant 0 : index
    %173 = vector.load %arg2[%c0_133, %172, %c0_134, %c0_135] : memref<1x9x9x16xbf16, #tpu.memory_space<vmem>>, vector<1x1x8x16xbf16>
    %174 = vector.shape_cast %173 : vector<1x1x8x16xbf16> to vector<8x16xbf16>
    %c0_136 = arith.constant 0 : index
    %c0_137 = arith.constant 0 : index
    %c0_138 = arith.constant 0 : index
    %175 = vector.load %arg3[%c0_136, %c0_137, %c0_138] : memref<4x16x8xbf16, #tpu.memory_space<vmem>>, vector<1x16x8xbf16>
    %176 = vector.shape_cast %175 : vector<1x16x8xbf16> to vector<16x8xbf16>
    %cst_139 = arith.constant dense<0.000000e+00> : vector<8x8xf32>
    %177 = tpu.matmul %174, %176, %cst_139 {dimension_numbers = #tpu.dot_dimension_numbers<[1], [0], [0], [1], [0, 0, 1, 1], [], []>} : vector<8x16xbf16>, vector<16x8xbf16>, vector<8x8xf32> -> vector<8x8xf32>
    %178 = arith.addf %169, %177 : vector<8x8xf32>
    %c3_i32_140 = arith.constant 3 : i32
    %179 = arith.addi %0, %c3_i32_140 : i32
    %c0_i32_141 = arith.constant 0 : i32
    %180 = arith.addi %179, %c0_i32_141 : i32
    %c0_142 = arith.constant 0 : index
    %181 = arith.index_cast %180 : i32 to index
    %c1_143 = arith.constant 1 : index
    %c0_144 = arith.constant 0 : index
    %182 = vector.load %arg2[%c0_142, %181, %c1_143, %c0_144] : memref<1x9x9x16xbf16, #tpu.memory_space<vmem>>, vector<1x1x8x16xbf16>
    %183 = vector.shape_cast %182 : vector<1x1x8x16xbf16> to vector<8x16xbf16>
    %c1_145 = arith.constant 1 : index
    %c0_146 = arith.constant 0 : index
    %c0_147 = arith.constant 0 : index
    %184 = vector.load %arg3[%c1_145, %c0_146, %c0_147] : memref<4x16x8xbf16, #tpu.memory_space<vmem>>, vector<1x16x8xbf16>
    %185 = vector.shape_cast %184 : vector<1x16x8xbf16> to vector<16x8xbf16>
    %cst_148 = arith.constant dense<0.000000e+00> : vector<8x8xf32>
    %186 = tpu.matmul %183, %185, %cst_148 {dimension_numbers = #tpu.dot_dimension_numbers<[1], [0], [0], [1], [0, 0, 1, 1], [], []>} : vector<8x16xbf16>, vector<16x8xbf16>, vector<8x8xf32> -> vector<8x8xf32>
    %187 = arith.addf %178, %186 : vector<8x8xf32>
    %c3_i32_149 = arith.constant 3 : i32
    %188 = arith.addi %0, %c3_i32_149 : i32
    %c1_i32_150 = arith.constant 1 : i32
    %189 = arith.addi %188, %c1_i32_150 : i32
    %c0_151 = arith.constant 0 : index
    %190 = arith.index_cast %189 : i32 to index
    %c0_152 = arith.constant 0 : index
    %c0_153 = arith.constant 0 : index
    %191 = vector.load %arg2[%c0_151, %190, %c0_152, %c0_153] : memref<1x9x9x16xbf16, #tpu.memory_space<vmem>>, vector<1x1x8x16xbf16>
    %192 = vector.shape_cast %191 : vector<1x1x8x16xbf16> to vector<8x16xbf16>
    %c2_154 = arith.constant 2 : index
    %c0_155 = arith.constant 0 : index
    %c0_156 = arith.constant 0 : index
    %193 = vector.load %arg3[%c2_154, %c0_155, %c0_156] : memref<4x16x8xbf16, #tpu.memory_space<vmem>>, vector<1x16x8xbf16>
    %194 = vector.shape_cast %193 : vector<1x16x8xbf16> to vector<16x8xbf16>
    %cst_157 = arith.constant dense<0.000000e+00> : vector<8x8xf32>
    %195 = tpu.matmul %192, %194, %cst_157 {dimension_numbers = #tpu.dot_dimension_numbers<[1], [0], [0], [1], [0, 0, 1, 1], [], []>} : vector<8x16xbf16>, vector<16x8xbf16>, vector<8x8xf32> -> vector<8x8xf32>
    %196 = arith.addf %187, %195 : vector<8x8xf32>
    %c3_i32_158 = arith.constant 3 : i32
    %197 = arith.addi %0, %c3_i32_158 : i32
    %c1_i32_159 = arith.constant 1 : i32
    %198 = arith.addi %197, %c1_i32_159 : i32
    %c0_160 = arith.constant 0 : index
    %199 = arith.index_cast %198 : i32 to index
    %c1_161 = arith.constant 1 : index
    %c0_162 = arith.constant 0 : index
    %200 = vector.load %arg2[%c0_160, %199, %c1_161, %c0_162] : memref<1x9x9x16xbf16, #tpu.memory_space<vmem>>, vector<1x1x8x16xbf16>
    %201 = vector.shape_cast %200 : vector<1x1x8x16xbf16> to vector<8x16xbf16>
    %c3_163 = arith.constant 3 : index
    %c0_164 = arith.constant 0 : index
    %c0_165 = arith.constant 0 : index
    %202 = vector.load %arg3[%c3_163, %c0_164, %c0_165] : memref<4x16x8xbf16, #tpu.memory_space<vmem>>, vector<1x16x8xbf16>
    %203 = vector.shape_cast %202 : vector<1x16x8xbf16> to vector<16x8xbf16>
    %cst_166 = arith.constant dense<0.000000e+00> : vector<8x8xf32>
    %204 = tpu.matmul %201, %203, %cst_166 {dimension_numbers = #tpu.dot_dimension_numbers<[1], [0], [0], [1], [0, 0, 1, 1], [], []>} : vector<8x16xbf16>, vector<16x8xbf16>, vector<8x8xf32> -> vector<8x8xf32>
    %205 = arith.addf %196, %204 : vector<8x8xf32>
    %206 = vector.broadcast %1 : vector<1x8xf32> to vector<8x8xf32>
    %207 = arith.addf %205, %206 : vector<8x8xf32>
    %cst_167 = arith.constant 0.000000e+00 : f32
    %208 = vector.broadcast %cst_167 : f32 to vector<8x8xf32>
    %209 = arith.cmpf ogt, %207, %208 : vector<8x8xf32>
    %cst_168 = arith.constant 0.00999999977 : f32
    %210 = vector.broadcast %cst_168 : f32 to vector<8x8xf32>
    %211 = arith.mulf %210, %207 : vector<8x8xf32>
    %212 = arith.select %209, %207, %211 : vector<8x8xi1>, vector<8x8xf32>
    %213 = arith.truncf %212 : vector<8x8xf32> to vector<8x8xbf16>
    %c0_169 = arith.constant 0 : index
    %c3_170 = arith.constant 3 : index
    %c0_171 = arith.constant 0 : index
    %c0_172 = arith.constant 0 : index
    %214 = vector.load %arg5[%c0_169, %c3_170, %c0_171, %c0_172] : memref<1x8x8x8xbf16, #tpu.memory_space<vmem>>, vector<1x1x8x8xbf16>
    %215 = vector.shape_cast %214 : vector<1x1x8x8xbf16> to vector<8x8xbf16>
    %216 = vector.shape_cast %213 : vector<8x8xbf16> to vector<1x1x8x8xbf16>
    tpu.vector_store %arg5[%c0_169, %c3_170, %c0_171, %c0_172], %216 {strides = array<i32>} : memref<1x8x8x8xbf16, #tpu.memory_space<vmem>>, vector<1x1x8x8xbf16>,
    %cst_173 = arith.constant dense<0.000000e+00> : vector<8xf32>
    %217 = vector.multi_reduction <add>, %212, %cst_173 [0] : vector<8x8xf32> to vector<8xf32>
    %218 = vector.shape_cast %217 : vector<8xf32> to vector<1x8xf32>
    %219 = arith.addf %164, %218 : vector<1x8xf32>
    %220 = arith.mulf %212, %212 : vector<8x8xf32>
    %cst_174 = arith.constant dense<0.000000e+00> : vector<8xf32>
    %221 = vector.multi_reduction <add>, %220, %cst_174 [0] : vector<8x8xf32> to vector<8xf32>
    %222 = vector.shape_cast %221 : vector<8xf32> to vector<1x8xf32>
    %223 = arith.addf %168, %222 : vector<1x8xf32>
    %cst_175 = arith.constant 0.000000e+00 : f32
    %224 = vector.broadcast %cst_175 : f32 to vector<8x8xf32>
    %c4_i32 = arith.constant 4 : i32
    %225 = arith.addi %0, %c4_i32 : i32
    %c0_i32_176 = arith.constant 0 : i32
    %226 = arith.addi %225, %c0_i32_176 : i32
    %c0_177 = arith.constant 0 : index
    %227 = arith.index_cast %226 : i32 to index
    %c0_178 = arith.constant 0 : index
    %c0_179 = arith.constant 0 : index
    %228 = vector.load %arg2[%c0_177, %227, %c0_178, %c0_179] : memref<1x9x9x16xbf16, #tpu.memory_space<vmem>>, vector<1x1x8x16xbf16>
    %229 = vector.shape_cast %228 : vector<1x1x8x16xbf16> to vector<8x16xbf16>
    %c0_180 = arith.constant 0 : index
    %c0_181 = arith.constant 0 : index
    %c0_182 = arith.constant 0 : index
    %230 = vector.load %arg3[%c0_180, %c0_181, %c0_182] : memref<4x16x8xbf16, #tpu.memory_space<vmem>>, vector<1x16x8xbf16>
    %231 = vector.shape_cast %230 : vector<1x16x8xbf16> to vector<16x8xbf16>
    %cst_183 = arith.constant dense<0.000000e+00> : vector<8x8xf32>
    %232 = tpu.matmul %229, %231, %cst_183 {dimension_numbers = #tpu.dot_dimension_numbers<[1], [0], [0], [1], [0, 0, 1, 1], [], []>} : vector<8x16xbf16>, vector<16x8xbf16>, vector<8x8xf32> -> vector<8x8xf32>
    %233 = arith.addf %224, %232 : vector<8x8xf32>
    %c4_i32_184 = arith.constant 4 : i32
    %234 = arith.addi %0, %c4_i32_184 : i32
    %c0_i32_185 = arith.constant 0 : i32
    %235 = arith.addi %234, %c0_i32_185 : i32
    %c0_186 = arith.constant 0 : index
    %236 = arith.index_cast %235 : i32 to index
    %c1_187 = arith.constant 1 : index
    %c0_188 = arith.constant 0 : index
    %237 = vector.load %arg2[%c0_186, %236, %c1_187, %c0_188] : memref<1x9x9x16xbf16, #tpu.memory_space<vmem>>, vector<1x1x8x16xbf16>
    %238 = vector.shape_cast %237 : vector<1x1x8x16xbf16> to vector<8x16xbf16>
    %c1_189 = arith.constant 1 : index
    %c0_190 = arith.constant 0 : index
    %c0_191 = arith.constant 0 : index
    %239 = vector.load %arg3[%c1_189, %c0_190, %c0_191] : memref<4x16x8xbf16, #tpu.memory_space<vmem>>, vector<1x16x8xbf16>
    %240 = vector.shape_cast %239 : vector<1x16x8xbf16> to vector<16x8xbf16>
    %cst_192 = arith.constant dense<0.000000e+00> : vector<8x8xf32>
    %241 = tpu.matmul %238, %240, %cst_192 {dimension_numbers = #tpu.dot_dimension_numbers<[1], [0], [0], [1], [0, 0, 1, 1], [], []>} : vector<8x16xbf16>, vector<16x8xbf16>, vector<8x8xf32> -> vector<8x8xf32>
    %242 = arith.addf %233, %241 : vector<8x8xf32>
    %c4_i32_193 = arith.constant 4 : i32
    %243 = arith.addi %0, %c4_i32_193 : i32
    %c1_i32_194 = arith.constant 1 : i32
    %244 = arith.addi %243, %c1_i32_194 : i32
    %c0_195 = arith.constant 0 : index
    %245 = arith.index_cast %244 : i32 to index
    %c0_196 = arith.constant 0 : index
    %c0_197 = arith.constant 0 : index
    %246 = vector.load %arg2[%c0_195, %245, %c0_196, %c0_197] : memref<1x9x9x16xbf16, #tpu.memory_space<vmem>>, vector<1x1x8x16xbf16>
    %247 = vector.shape_cast %246 : vector<1x1x8x16xbf16> to vector<8x16xbf16>
    %c2_198 = arith.constant 2 : index
    %c0_199 = arith.constant 0 : index
    %c0_200 = arith.constant 0 : index
    %248 = vector.load %arg3[%c2_198, %c0_199, %c0_200] : memref<4x16x8xbf16, #tpu.memory_space<vmem>>, vector<1x16x8xbf16>
    %249 = vector.shape_cast %248 : vector<1x16x8xbf16> to vector<16x8xbf16>
    %cst_201 = arith.constant dense<0.000000e+00> : vector<8x8xf32>
    %250 = tpu.matmul %247, %249, %cst_201 {dimension_numbers = #tpu.dot_dimension_numbers<[1], [0], [0], [1], [0, 0, 1, 1], [], []>} : vector<8x16xbf16>, vector<16x8xbf16>, vector<8x8xf32> -> vector<8x8xf32>
    %251 = arith.addf %242, %250 : vector<8x8xf32>
    %c4_i32_202 = arith.constant 4 : i32
    %252 = arith.addi %0, %c4_i32_202 : i32
    %c1_i32_203 = arith.constant 1 : i32
    %253 = arith.addi %252, %c1_i32_203 : i32
    %c0_204 = arith.constant 0 : index
    %254 = arith.index_cast %253 : i32 to index
    %c1_205 = arith.constant 1 : index
    %c0_206 = arith.constant 0 : index
    %255 = vector.load %arg2[%c0_204, %254, %c1_205, %c0_206] : memref<1x9x9x16xbf16, #tpu.memory_space<vmem>>, vector<1x1x8x16xbf16>
    %256 = vector.shape_cast %255 : vector<1x1x8x16xbf16> to vector<8x16xbf16>
    %c3_207 = arith.constant 3 : index
    %c0_208 = arith.constant 0 : index
    %c0_209 = arith.constant 0 : index
    %257 = vector.load %arg3[%c3_207, %c0_208, %c0_209] : memref<4x16x8xbf16, #tpu.memory_space<vmem>>, vector<1x16x8xbf16>
    %258 = vector.shape_cast %257 : vector<1x16x8xbf16> to vector<16x8xbf16>
    %cst_210 = arith.constant dense<0.000000e+00> : vector<8x8xf32>
    %259 = tpu.matmul %256, %258, %cst_210 {dimension_numbers = #tpu.dot_dimension_numbers<[1], [0], [0], [1], [0, 0, 1, 1], [], []>} : vector<8x16xbf16>, vector<16x8xbf16>, vector<8x8xf32> -> vector<8x8xf32>
    %260 = arith.addf %251, %259 : vector<8x8xf32>
    %261 = vector.broadcast %1 : vector<1x8xf32> to vector<8x8xf32>
    %262 = arith.addf %260, %261 : vector<8x8xf32>
    %cst_211 = arith.constant 0.000000e+00 : f32
    %263 = vector.broadcast %cst_211 : f32 to vector<8x8xf32>
    %264 = arith.cmpf ogt, %262, %263 : vector<8x8xf32>
    %cst_212 = arith.constant 0.00999999977 : f32
    %265 = vector.broadcast %cst_212 : f32 to vector<8x8xf32>
    %266 = arith.mulf %265, %262 : vector<8x8xf32>
    %267 = arith.select %264, %262, %266 : vector<8x8xi1>, vector<8x8xf32>
    %268 = arith.truncf %267 : vector<8x8xf32> to vector<8x8xbf16>
    %c0_213 = arith.constant 0 : index
    %c4 = arith.constant 4 : index
    %c0_214 = arith.constant 0 : index
    %c0_215 = arith.constant 0 : index
    %269 = vector.load %arg5[%c0_213, %c4, %c0_214, %c0_215] : memref<1x8x8x8xbf16, #tpu.memory_space<vmem>>, vector<1x1x8x8xbf16>
    %270 = vector.shape_cast %269 : vector<1x1x8x8xbf16> to vector<8x8xbf16>
    %271 = vector.shape_cast %268 : vector<8x8xbf16> to vector<1x1x8x8xbf16>
    tpu.vector_store %arg5[%c0_213, %c4, %c0_214, %c0_215], %271 {strides = array<i32>} : memref<1x8x8x8xbf16, #tpu.memory_space<vmem>>, vector<1x1x8x8xbf16>,
    %cst_216 = arith.constant dense<0.000000e+00> : vector<8xf32>
    %272 = vector.multi_reduction <add>, %267, %cst_216 [0] : vector<8x8xf32> to vector<8xf32>
    %273 = vector.shape_cast %272 : vector<8xf32> to vector<1x8xf32>
    %274 = arith.addf %219, %273 : vector<1x8xf32>
    %275 = arith.mulf %267, %267 : vector<8x8xf32>
    %cst_217 = arith.constant dense<0.000000e+00> : vector<8xf32>
    %276 = vector.multi_reduction <add>, %275, %cst_217 [0] : vector<8x8xf32> to vector<8xf32>
    %277 = vector.shape_cast %276 : vector<8xf32> to vector<1x8xf32>
    %278 = arith.addf %223, %277 : vector<1x8xf32>
    %cst_218 = arith.constant 0.000000e+00 : f32
    %279 = vector.broadcast %cst_218 : f32 to vector<8x8xf32>
    %c5_i32 = arith.constant 5 : i32
    %280 = arith.addi %0, %c5_i32 : i32
    %c0_i32_219 = arith.constant 0 : i32
    %281 = arith.addi %280, %c0_i32_219 : i32
    %c0_220 = arith.constant 0 : index
    %282 = arith.index_cast %281 : i32 to index
    %c0_221 = arith.constant 0 : index
    %c0_222 = arith.constant 0 : index
    %283 = vector.load %arg2[%c0_220, %282, %c0_221, %c0_222] : memref<1x9x9x16xbf16, #tpu.memory_space<vmem>>, vector<1x1x8x16xbf16>
    %284 = vector.shape_cast %283 : vector<1x1x8x16xbf16> to vector<8x16xbf16>
    %c0_223 = arith.constant 0 : index
    %c0_224 = arith.constant 0 : index
    %c0_225 = arith.constant 0 : index
    %285 = vector.load %arg3[%c0_223, %c0_224, %c0_225] : memref<4x16x8xbf16, #tpu.memory_space<vmem>>, vector<1x16x8xbf16>
    %286 = vector.shape_cast %285 : vector<1x16x8xbf16> to vector<16x8xbf16>
    %cst_226 = arith.constant dense<0.000000e+00> : vector<8x8xf32>
    %287 = tpu.matmul %284, %286, %cst_226 {dimension_numbers = #tpu.dot_dimension_numbers<[1], [0], [0], [1], [0, 0, 1, 1], [], []>} : vector<8x16xbf16>, vector<16x8xbf16>, vector<8x8xf32> -> vector<8x8xf32>
    %288 = arith.addf %279, %287 : vector<8x8xf32>
    %c5_i32_227 = arith.constant 5 : i32
    %289 = arith.addi %0, %c5_i32_227 : i32
    %c0_i32_228 = arith.constant 0 : i32
    %290 = arith.addi %289, %c0_i32_228 : i32
    %c0_229 = arith.constant 0 : index
    %291 = arith.index_cast %290 : i32 to index
    %c1_230 = arith.constant 1 : index
    %c0_231 = arith.constant 0 : index
    %292 = vector.load %arg2[%c0_229, %291, %c1_230, %c0_231] : memref<1x9x9x16xbf16, #tpu.memory_space<vmem>>, vector<1x1x8x16xbf16>
    %293 = vector.shape_cast %292 : vector<1x1x8x16xbf16> to vector<8x16xbf16>
    %c1_232 = arith.constant 1 : index
    %c0_233 = arith.constant 0 : index
    %c0_234 = arith.constant 0 : index
    %294 = vector.load %arg3[%c1_232, %c0_233, %c0_234] : memref<4x16x8xbf16, #tpu.memory_space<vmem>>, vector<1x16x8xbf16>
    %295 = vector.shape_cast %294 : vector<1x16x8xbf16> to vector<16x8xbf16>
    %cst_235 = arith.constant dense<0.000000e+00> : vector<8x8xf32>
    %296 = tpu.matmul %293, %295, %cst_235 {dimension_numbers = #tpu.dot_dimension_numbers<[1], [0], [0], [1], [0, 0, 1, 1], [], []>} : vector<8x16xbf16>, vector<16x8xbf16>, vector<8x8xf32> -> vector<8x8xf32>
    %297 = arith.addf %288, %296 : vector<8x8xf32>
    %c5_i32_236 = arith.constant 5 : i32
    %298 = arith.addi %0, %c5_i32_236 : i32
    %c1_i32_237 = arith.constant 1 : i32
    %299 = arith.addi %298, %c1_i32_237 : i32
    %c0_238 = arith.constant 0 : index
    %300 = arith.index_cast %299 : i32 to index
    %c0_239 = arith.constant 0 : index
    %c0_240 = arith.constant 0 : index
    %301 = vector.load %arg2[%c0_238, %300, %c0_239, %c0_240] : memref<1x9x9x16xbf16, #tpu.memory_space<vmem>>, vector<1x1x8x16xbf16>
    %302 = vector.shape_cast %301 : vector<1x1x8x16xbf16> to vector<8x16xbf16>
    %c2_241 = arith.constant 2 : index
    %c0_242 = arith.constant 0 : index
    %c0_243 = arith.constant 0 : index
    %303 = vector.load %arg3[%c2_241, %c0_242, %c0_243] : memref<4x16x8xbf16, #tpu.memory_space<vmem>>, vector<1x16x8xbf16>
    %304 = vector.shape_cast %303 : vector<1x16x8xbf16> to vector<16x8xbf16>
    %cst_244 = arith.constant dense<0.000000e+00> : vector<8x8xf32>
    %305 = tpu.matmul %302, %304, %cst_244 {dimension_numbers = #tpu.dot_dimension_numbers<[1], [0], [0], [1], [0, 0, 1, 1], [], []>} : vector<8x16xbf16>, vector<16x8xbf16>, vector<8x8xf32> -> vector<8x8xf32>
    %306 = arith.addf %297, %305 : vector<8x8xf32>
    %c5_i32_245 = arith.constant 5 : i32
    %307 = arith.addi %0, %c5_i32_245 : i32
    %c1_i32_246 = arith.constant 1 : i32
    %308 = arith.addi %307, %c1_i32_246 : i32
    %c0_247 = arith.constant 0 : index
    %309 = arith.index_cast %308 : i32 to index
    %c1_248 = arith.constant 1 : index
    %c0_249 = arith.constant 0 : index
    %310 = vector.load %arg2[%c0_247, %309, %c1_248, %c0_249] : memref<1x9x9x16xbf16, #tpu.memory_space<vmem>>, vector<1x1x8x16xbf16>
    %311 = vector.shape_cast %310 : vector<1x1x8x16xbf16> to vector<8x16xbf16>
    %c3_250 = arith.constant 3 : index
    %c0_251 = arith.constant 0 : index
    %c0_252 = arith.constant 0 : index
    %312 = vector.load %arg3[%c3_250, %c0_251, %c0_252] : memref<4x16x8xbf16, #tpu.memory_space<vmem>>, vector<1x16x8xbf16>
    %313 = vector.shape_cast %312 : vector<1x16x8xbf16> to vector<16x8xbf16>
    %cst_253 = arith.constant dense<0.000000e+00> : vector<8x8xf32>
    %314 = tpu.matmul %311, %313, %cst_253 {dimension_numbers = #tpu.dot_dimension_numbers<[1], [0], [0], [1], [0, 0, 1, 1], [], []>} : vector<8x16xbf16>, vector<16x8xbf16>, vector<8x8xf32> -> vector<8x8xf32>
    %315 = arith.addf %306, %314 : vector<8x8xf32>
    %316 = vector.broadcast %1 : vector<1x8xf32> to vector<8x8xf32>
    %317 = arith.addf %315, %316 : vector<8x8xf32>
    %cst_254 = arith.constant 0.000000e+00 : f32
    %318 = vector.broadcast %cst_254 : f32 to vector<8x8xf32>
    %319 = arith.cmpf ogt, %317, %318 : vector<8x8xf32>
    %cst_255 = arith.constant 0.00999999977 : f32
    %320 = vector.broadcast %cst_255 : f32 to vector<8x8xf32>
    %321 = arith.mulf %320, %317 : vector<8x8xf32>
    %322 = arith.select %319, %317, %321 : vector<8x8xi1>, vector<8x8xf32>
    %323 = arith.truncf %322 : vector<8x8xf32> to vector<8x8xbf16>
    %c0_256 = arith.constant 0 : index
    %c5 = arith.constant 5 : index
    %c0_257 = arith.constant 0 : index
    %c0_258 = arith.constant 0 : index
    %324 = vector.load %arg5[%c0_256, %c5, %c0_257, %c0_258] : memref<1x8x8x8xbf16, #tpu.memory_space<vmem>>, vector<1x1x8x8xbf16>
    %325 = vector.shape_cast %324 : vector<1x1x8x8xbf16> to vector<8x8xbf16>
    %326 = vector.shape_cast %323 : vector<8x8xbf16> to vector<1x1x8x8xbf16>
    tpu.vector_store %arg5[%c0_256, %c5, %c0_257, %c0_258], %326 {strides = array<i32>} : memref<1x8x8x8xbf16, #tpu.memory_space<vmem>>, vector<1x1x8x8xbf16>,
    %cst_259 = arith.constant dense<0.000000e+00> : vector<8xf32>
    %327 = vector.multi_reduction <add>, %322, %cst_259 [0] : vector<8x8xf32> to vector<8xf32>
    %328 = vector.shape_cast %327 : vector<8xf32> to vector<1x8xf32>
    %329 = arith.addf %274, %328 : vector<1x8xf32>
    %330 = arith.mulf %322, %322 : vector<8x8xf32>
    %cst_260 = arith.constant dense<0.000000e+00> : vector<8xf32>
    %331 = vector.multi_reduction <add>, %330, %cst_260 [0] : vector<8x8xf32> to vector<8xf32>
    %332 = vector.shape_cast %331 : vector<8xf32> to vector<1x8xf32>
    %333 = arith.addf %278, %332 : vector<1x8xf32>
    %cst_261 = arith.constant 0.000000e+00 : f32
    %334 = vector.broadcast %cst_261 : f32 to vector<8x8xf32>
    %c6_i32 = arith.constant 6 : i32
    %335 = arith.addi %0, %c6_i32 : i32
    %c0_i32_262 = arith.constant 0 : i32
    %336 = arith.addi %335, %c0_i32_262 : i32
    %c0_263 = arith.constant 0 : index
    %337 = arith.index_cast %336 : i32 to index
    %c0_264 = arith.constant 0 : index
    %c0_265 = arith.constant 0 : index
    %338 = vector.load %arg2[%c0_263, %337, %c0_264, %c0_265] : memref<1x9x9x16xbf16, #tpu.memory_space<vmem>>, vector<1x1x8x16xbf16>
    %339 = vector.shape_cast %338 : vector<1x1x8x16xbf16> to vector<8x16xbf16>
    %c0_266 = arith.constant 0 : index
    %c0_267 = arith.constant 0 : index
    %c0_268 = arith.constant 0 : index
    %340 = vector.load %arg3[%c0_266, %c0_267, %c0_268] : memref<4x16x8xbf16, #tpu.memory_space<vmem>>, vector<1x16x8xbf16>
    %341 = vector.shape_cast %340 : vector<1x16x8xbf16> to vector<16x8xbf16>
    %cst_269 = arith.constant dense<0.000000e+00> : vector<8x8xf32>
    %342 = tpu.matmul %339, %341, %cst_269 {dimension_numbers = #tpu.dot_dimension_numbers<[1], [0], [0], [1], [0, 0, 1, 1], [], []>} : vector<8x16xbf16>, vector<16x8xbf16>, vector<8x8xf32> -> vector<8x8xf32>
    %343 = arith.addf %334, %342 : vector<8x8xf32>
    %c6_i32_270 = arith.constant 6 : i32
    %344 = arith.addi %0, %c6_i32_270 : i32
    %c0_i32_271 = arith.constant 0 : i32
    %345 = arith.addi %344, %c0_i32_271 : i32
    %c0_272 = arith.constant 0 : index
    %346 = arith.index_cast %345 : i32 to index
    %c1_273 = arith.constant 1 : index
    %c0_274 = arith.constant 0 : index
    %347 = vector.load %arg2[%c0_272, %346, %c1_273, %c0_274] : memref<1x9x9x16xbf16, #tpu.memory_space<vmem>>, vector<1x1x8x16xbf16>
    %348 = vector.shape_cast %347 : vector<1x1x8x16xbf16> to vector<8x16xbf16>
    %c1_275 = arith.constant 1 : index
    %c0_276 = arith.constant 0 : index
    %c0_277 = arith.constant 0 : index
    %349 = vector.load %arg3[%c1_275, %c0_276, %c0_277] : memref<4x16x8xbf16, #tpu.memory_space<vmem>>, vector<1x16x8xbf16>
    %350 = vector.shape_cast %349 : vector<1x16x8xbf16> to vector<16x8xbf16>
    %cst_278 = arith.constant dense<0.000000e+00> : vector<8x8xf32>
    %351 = tpu.matmul %348, %350, %cst_278 {dimension_numbers = #tpu.dot_dimension_numbers<[1], [0], [0], [1], [0, 0, 1, 1], [], []>} : vector<8x16xbf16>, vector<16x8xbf16>, vector<8x8xf32> -> vector<8x8xf32>
    %352 = arith.addf %343, %351 : vector<8x8xf32>
    %c6_i32_279 = arith.constant 6 : i32
    %353 = arith.addi %0, %c6_i32_279 : i32
    %c1_i32_280 = arith.constant 1 : i32
    %354 = arith.addi %353, %c1_i32_280 : i32
    %c0_281 = arith.constant 0 : index
    %355 = arith.index_cast %354 : i32 to index
    %c0_282 = arith.constant 0 : index
    %c0_283 = arith.constant 0 : index
    %356 = vector.load %arg2[%c0_281, %355, %c0_282, %c0_283] : memref<1x9x9x16xbf16, #tpu.memory_space<vmem>>, vector<1x1x8x16xbf16>
    %357 = vector.shape_cast %356 : vector<1x1x8x16xbf16> to vector<8x16xbf16>
    %c2_284 = arith.constant 2 : index
    %c0_285 = arith.constant 0 : index
    %c0_286 = arith.constant 0 : index
    %358 = vector.load %arg3[%c2_284, %c0_285, %c0_286] : memref<4x16x8xbf16, #tpu.memory_space<vmem>>, vector<1x16x8xbf16>
    %359 = vector.shape_cast %358 : vector<1x16x8xbf16> to vector<16x8xbf16>
    %cst_287 = arith.constant dense<0.000000e+00> : vector<8x8xf32>
    %360 = tpu.matmul %357, %359, %cst_287 {dimension_numbers = #tpu.dot_dimension_numbers<[1], [0], [0], [1], [0, 0, 1, 1], [], []>} : vector<8x16xbf16>, vector<16x8xbf16>, vector<8x8xf32> -> vector<8x8xf32>
    %361 = arith.addf %352, %360 : vector<8x8xf32>
    %c6_i32_288 = arith.constant 6 : i32
    %362 = arith.addi %0, %c6_i32_288 : i32
    %c1_i32_289 = arith.constant 1 : i32
    %363 = arith.addi %362, %c1_i32_289 : i32
    %c0_290 = arith.constant 0 : index
    %364 = arith.index_cast %363 : i32 to index
    %c1_291 = arith.constant 1 : index
    %c0_292 = arith.constant 0 : index
    %365 = vector.load %arg2[%c0_290, %364, %c1_291, %c0_292] : memref<1x9x9x16xbf16, #tpu.memory_space<vmem>>, vector<1x1x8x16xbf16>
    %366 = vector.shape_cast %365 : vector<1x1x8x16xbf16> to vector<8x16xbf16>
    %c3_293 = arith.constant 3 : index
    %c0_294 = arith.constant 0 : index
    %c0_295 = arith.constant 0 : index
    %367 = vector.load %arg3[%c3_293, %c0_294, %c0_295] : memref<4x16x8xbf16, #tpu.memory_space<vmem>>, vector<1x16x8xbf16>
    %368 = vector.shape_cast %367 : vector<1x16x8xbf16> to vector<16x8xbf16>
    %cst_296 = arith.constant dense<0.000000e+00> : vector<8x8xf32>
    %369 = tpu.matmul %366, %368, %cst_296 {dimension_numbers = #tpu.dot_dimension_numbers<[1], [0], [0], [1], [0, 0, 1, 1], [], []>} : vector<8x16xbf16>, vector<16x8xbf16>, vector<8x8xf32> -> vector<8x8xf32>
    %370 = arith.addf %361, %369 : vector<8x8xf32>
    %371 = vector.broadcast %1 : vector<1x8xf32> to vector<8x8xf32>
    %372 = arith.addf %370, %371 : vector<8x8xf32>
    %cst_297 = arith.constant 0.000000e+00 : f32
    %373 = vector.broadcast %cst_297 : f32 to vector<8x8xf32>
    %374 = arith.cmpf ogt, %372, %373 : vector<8x8xf32>
    %cst_298 = arith.constant 0.00999999977 : f32
    %375 = vector.broadcast %cst_298 : f32 to vector<8x8xf32>
    %376 = arith.mulf %375, %372 : vector<8x8xf32>
    %377 = arith.select %374, %372, %376 : vector<8x8xi1>, vector<8x8xf32>
    %378 = arith.truncf %377 : vector<8x8xf32> to vector<8x8xbf16>
    %c0_299 = arith.constant 0 : index
    %c6 = arith.constant 6 : index
    %c0_300 = arith.constant 0 : index
    %c0_301 = arith.constant 0 : index
    %379 = vector.load %arg5[%c0_299, %c6, %c0_300, %c0_301] : memref<1x8x8x8xbf16, #tpu.memory_space<vmem>>, vector<1x1x8x8xbf16>
    %380 = vector.shape_cast %379 : vector<1x1x8x8xbf16> to vector<8x8xbf16>
    %381 = vector.shape_cast %378 : vector<8x8xbf16> to vector<1x1x8x8xbf16>
    tpu.vector_store %arg5[%c0_299, %c6, %c0_300, %c0_301], %381 {strides = array<i32>} : memref<1x8x8x8xbf16, #tpu.memory_space<vmem>>, vector<1x1x8x8xbf16>,
    %cst_302 = arith.constant dense<0.000000e+00> : vector<8xf32>
    %382 = vector.multi_reduction <add>, %377, %cst_302 [0] : vector<8x8xf32> to vector<8xf32>
    %383 = vector.shape_cast %382 : vector<8xf32> to vector<1x8xf32>
    %384 = arith.addf %329, %383 : vector<1x8xf32>
    %385 = arith.mulf %377, %377 : vector<8x8xf32>
    %cst_303 = arith.constant dense<0.000000e+00> : vector<8xf32>
    %386 = vector.multi_reduction <add>, %385, %cst_303 [0] : vector<8x8xf32> to vector<8xf32>
    %387 = vector.shape_cast %386 : vector<8xf32> to vector<1x8xf32>
    %388 = arith.addf %333, %387 : vector<1x8xf32>
    %cst_304 = arith.constant 0.000000e+00 : f32
    %389 = vector.broadcast %cst_304 : f32 to vector<8x8xf32>
    %c7_i32 = arith.constant 7 : i32
    %390 = arith.addi %0, %c7_i32 : i32
    %c0_i32_305 = arith.constant 0 : i32
    %391 = arith.addi %390, %c0_i32_305 : i32
    %c0_306 = arith.constant 0 : index
    %392 = arith.index_cast %391 : i32 to index
    %c0_307 = arith.constant 0 : index
    %c0_308 = arith.constant 0 : index
    %393 = vector.load %arg2[%c0_306, %392, %c0_307, %c0_308] : memref<1x9x9x16xbf16, #tpu.memory_space<vmem>>, vector<1x1x8x16xbf16>
    %394 = vector.shape_cast %393 : vector<1x1x8x16xbf16> to vector<8x16xbf16>
    %c0_309 = arith.constant 0 : index
    %c0_310 = arith.constant 0 : index
    %c0_311 = arith.constant 0 : index
    %395 = vector.load %arg3[%c0_309, %c0_310, %c0_311] : memref<4x16x8xbf16, #tpu.memory_space<vmem>>, vector<1x16x8xbf16>
    %396 = vector.shape_cast %395 : vector<1x16x8xbf16> to vector<16x8xbf16>
    %cst_312 = arith.constant dense<0.000000e+00> : vector<8x8xf32>
    %397 = tpu.matmul %394, %396, %cst_312 {dimension_numbers = #tpu.dot_dimension_numbers<[1], [0], [0], [1], [0, 0, 1, 1], [], []>} : vector<8x16xbf16>, vector<16x8xbf16>, vector<8x8xf32> -> vector<8x8xf32>
    %398 = arith.addf %389, %397 : vector<8x8xf32>
    %c7_i32_313 = arith.constant 7 : i32
    %399 = arith.addi %0, %c7_i32_313 : i32
    %c0_i32_314 = arith.constant 0 : i32
    %400 = arith.addi %399, %c0_i32_314 : i32
    %c0_315 = arith.constant 0 : index
    %401 = arith.index_cast %400 : i32 to index
    %c1_316 = arith.constant 1 : index
    %c0_317 = arith.constant 0 : index
    %402 = vector.load %arg2[%c0_315, %401, %c1_316, %c0_317] : memref<1x9x9x16xbf16, #tpu.memory_space<vmem>>, vector<1x1x8x16xbf16>
    %403 = vector.shape_cast %402 : vector<1x1x8x16xbf16> to vector<8x16xbf16>
    %c1_318 = arith.constant 1 : index
    %c0_319 = arith.constant 0 : index
    %c0_320 = arith.constant 0 : index
    %404 = vector.load %arg3[%c1_318, %c0_319, %c0_320] : memref<4x16x8xbf16, #tpu.memory_space<vmem>>, vector<1x16x8xbf16>
    %405 = vector.shape_cast %404 : vector<1x16x8xbf16> to vector<16x8xbf16>
    %cst_321 = arith.constant dense<0.000000e+00> : vector<8x8xf32>
    %406 = tpu.matmul %403, %405, %cst_321 {dimension_numbers = #tpu.dot_dimension_numbers<[1], [0], [0], [1], [0, 0, 1, 1], [], []>} : vector<8x16xbf16>, vector<16x8xbf16>, vector<8x8xf32> -> vector<8x8xf32>
    %407 = arith.addf %398, %406 : vector<8x8xf32>
    %c7_i32_322 = arith.constant 7 : i32
    %408 = arith.addi %0, %c7_i32_322 : i32
    %c1_i32_323 = arith.constant 1 : i32
    %409 = arith.addi %408, %c1_i32_323 : i32
    %c0_324 = arith.constant 0 : index
    %410 = arith.index_cast %409 : i32 to index
    %c0_325 = arith.constant 0 : index
    %c0_326 = arith.constant 0 : index
    %411 = vector.load %arg2[%c0_324, %410, %c0_325, %c0_326] : memref<1x9x9x16xbf16, #tpu.memory_space<vmem>>, vector<1x1x8x16xbf16>
    %412 = vector.shape_cast %411 : vector<1x1x8x16xbf16> to vector<8x16xbf16>
    %c2_327 = arith.constant 2 : index
    %c0_328 = arith.constant 0 : index
    %c0_329 = arith.constant 0 : index
    %413 = vector.load %arg3[%c2_327, %c0_328, %c0_329] : memref<4x16x8xbf16, #tpu.memory_space<vmem>>, vector<1x16x8xbf16>
    %414 = vector.shape_cast %413 : vector<1x16x8xbf16> to vector<16x8xbf16>
    %cst_330 = arith.constant dense<0.000000e+00> : vector<8x8xf32>
    %415 = tpu.matmul %412, %414, %cst_330 {dimension_numbers = #tpu.dot_dimension_numbers<[1], [0], [0], [1], [0, 0, 1, 1], [], []>} : vector<8x16xbf16>, vector<16x8xbf16>, vector<8x8xf32> -> vector<8x8xf32>
    %416 = arith.addf %407, %415 : vector<8x8xf32>
    %c7_i32_331 = arith.constant 7 : i32
    %417 = arith.addi %0, %c7_i32_331 : i32
    %c1_i32_332 = arith.constant 1 : i32
    %418 = arith.addi %417, %c1_i32_332 : i32
    %c0_333 = arith.constant 0 : index
    %419 = arith.index_cast %418 : i32 to index
    %c1_334 = arith.constant 1 : index
    %c0_335 = arith.constant 0 : index
    %420 = vector.load %arg2[%c0_333, %419, %c1_334, %c0_335] : memref<1x9x9x16xbf16, #tpu.memory_space<vmem>>, vector<1x1x8x16xbf16>
    %421 = vector.shape_cast %420 : vector<1x1x8x16xbf16> to vector<8x16xbf16>
    %c3_336 = arith.constant 3 : index
    %c0_337 = arith.constant 0 : index
    %c0_338 = arith.constant 0 : index
    %422 = vector.load %arg3[%c3_336, %c0_337, %c0_338] : memref<4x16x8xbf16, #tpu.memory_space<vmem>>, vector<1x16x8xbf16>
    %423 = vector.shape_cast %422 : vector<1x16x8xbf16> to vector<16x8xbf16>
    %cst_339 = arith.constant dense<0.000000e+00> : vector<8x8xf32>
    %424 = tpu.matmul %421, %423, %cst_339 {dimension_numbers = #tpu.dot_dimension_numbers<[1], [0], [0], [1], [0, 0, 1, 1], [], []>} : vector<8x16xbf16>, vector<16x8xbf16>, vector<8x8xf32> -> vector<8x8xf32>
    %425 = arith.addf %416, %424 : vector<8x8xf32>
    %426 = vector.broadcast %1 : vector<1x8xf32> to vector<8x8xf32>
    %427 = arith.addf %425, %426 : vector<8x8xf32>
    %cst_340 = arith.constant 0.000000e+00 : f32
    %428 = vector.broadcast %cst_340 : f32 to vector<8x8xf32>
    %429 = arith.cmpf ogt, %427, %428 : vector<8x8xf32>
    %cst_341 = arith.constant 0.00999999977 : f32
    %430 = vector.broadcast %cst_341 : f32 to vector<8x8xf32>
    %431 = arith.mulf %430, %427 : vector<8x8xf32>
    %432 = arith.select %429, %427, %431 : vector<8x8xi1>, vector<8x8xf32>
    %433 = arith.truncf %432 : vector<8x8xf32> to vector<8x8xbf16>
    %c0_342 = arith.constant 0 : index
    %c7 = arith.constant 7 : index
    %c0_343 = arith.constant 0 : index
    %c0_344 = arith.constant 0 : index
    %434 = vector.load %arg5[%c0_342, %c7, %c0_343, %c0_344] : memref<1x8x8x8xbf16, #tpu.memory_space<vmem>>, vector<1x1x8x8xbf16>
    %435 = vector.shape_cast %434 : vector<1x1x8x8xbf16> to vector<8x8xbf16>
    %436 = vector.shape_cast %433 : vector<8x8xbf16> to vector<1x1x8x8xbf16>
    tpu.vector_store %arg5[%c0_342, %c7, %c0_343, %c0_344], %436 {strides = array<i32>} : memref<1x8x8x8xbf16, #tpu.memory_space<vmem>>, vector<1x1x8x8xbf16>,
    %cst_345 = arith.constant dense<0.000000e+00> : vector<8xf32>
    %437 = vector.multi_reduction <add>, %432, %cst_345 [0] : vector<8x8xf32> to vector<8xf32>
    %438 = vector.shape_cast %437 : vector<8xf32> to vector<1x8xf32>
    %439 = arith.addf %384, %438 : vector<1x8xf32>
    %440 = arith.mulf %432, %432 : vector<8x8xf32>
    %cst_346 = arith.constant dense<0.000000e+00> : vector<8xf32>
    %441 = vector.multi_reduction <add>, %440, %cst_346 [0] : vector<8x8xf32> to vector<8xf32>
    %442 = vector.shape_cast %441 : vector<8xf32> to vector<1x8xf32>
    %443 = arith.addf %388, %442 : vector<1x8xf32>
    %444 = vector.shape_cast %439 : vector<1x8xf32> to vector<1x1x1x8xf32>
    %c0_347 = arith.constant 0 : index
    %c0_348 = arith.constant 0 : index
    %c0_349 = arith.constant 0 : index
    %c0_350 = arith.constant 0 : index
    %445 = vector.load %arg6[%c0_347, %c0_348, %c0_349, %c0_350] : memref<1x1x1x8xf32, #tpu.memory_space<vmem>>, vector<1x1x1x8xf32>
    tpu.vector_store %arg6[%c0_347, %c0_348, %c0_349, %c0_350], %444 {strides = array<i32>} : memref<1x1x1x8xf32, #tpu.memory_space<vmem>>, vector<1x1x1x8xf32>,
    %446 = vector.shape_cast %443 : vector<1x8xf32> to vector<1x1x1x8xf32>
    %c0_351 = arith.constant 0 : index
    %c0_352 = arith.constant 0 : index
    %c0_353 = arith.constant 0 : index
    %c0_354 = arith.constant 0 : index
    %447 = vector.load %arg7[%c0_351, %c0_352, %c0_353, %c0_354] : memref<1x1x1x8xf32, #tpu.memory_space<vmem>>, vector<1x1x1x8xf32>
    tpu.vector_store %arg7[%c0_351, %c0_352, %c0_353, %c0_354], %446 {strides = array<i32>} : memref<1x1x1x8xf32, #tpu.memory_space<vmem>>, vector<1x1x1x8xf32>,
    return
  }
  func.func @transform_0(%arg0: i32, %arg1: i32) -> (i32, i32, i32, i32) {
    %c0_i32 = arith.constant 0 : i32
    %c0_i32_0 = arith.constant 0 : i32
    %c0_i32_1 = arith.constant 0 : i32
    %c0_i32_2 = arith.constant 0 : i32
    return %arg0, %c0_i32, %c0_i32_0, %c0_i32_1 : i32, i32, i32, i32
  }
  func.func @transform_1(%arg0: i32, %arg1: i32) -> (i32, i32, i32) {
    %c0_i32 = arith.constant 0 : i32
    %c0_i32_0 = arith.constant 0 : i32
    %c0_i32_1 = arith.constant 0 : i32
    %c0_i32_2 = arith.constant 0 : i32
    return %c0_i32, %c0_i32_0, %c0_i32_1 : i32, i32, i32
  }
  func.func @transform_2(%arg0: i32, %arg1: i32) -> (i32, i32) {
    %c0_i32 = arith.constant 0 : i32
    %c0_i32_0 = arith.constant 0 : i32
    %c0_i32_1 = arith.constant 0 : i32
    return %c0_i32, %c0_i32_0 : i32, i32
  }
  func.func @transform_3(%arg0: i32, %arg1: i32) -> (i32, i32, i32, i32) {
    %c0_i32 = arith.constant 0 : i32
    %c0_i32_0 = arith.constant 0 : i32
    %c0_i32_1 = arith.constant 0 : i32
    return %arg0, %arg1, %c0_i32, %c0_i32_0 : i32, i32, i32, i32
  }
  func.func @transform_4(%arg0: i32, %arg1: i32) -> (i32, i32, i32, i32) {
    %c0_i32 = arith.constant 0 : i32
    %c0_i32_0 = arith.constant 0 : i32
    %c0_i32_1 = arith.constant 0 : i32
    return %arg0, %arg1, %c0_i32, %c0_i32_0 : i32, i32, i32, i32
  }
  func.func @transform_5(%arg0: i32, %arg1: i32) -> (i32, i32, i32, i32) {
    %c0_i32 = arith.constant 0 : i32
    %c0_i32_0 = arith.constant 0 : i32
    %c0_i32_1 = arith.constant 0 : i32
    return %arg0, %arg1, %c0_i32, %c0_i32_0 : i32, i32, i32, i32
  }
}

module attributes {stable_mosaic.version = 11 : i64} {
  func.func @_bn_apply_transpose_kernel(%arg0: i32, %arg1: i32, %arg2: memref<1x64x8xbf16, #tpu.memory_space<vmem>>, %arg3: memref<1x8xf32, #tpu.memory_space<vmem>>, %arg4: memref<1x8xf32, #tpu.memory_space<vmem>>, %arg5: memref<1x8x64xf32, #tpu.memory_space<vmem>>) attributes {dimension_semantics = [#tpu.dimension_semantics<parallel>, #tpu.dimension_semantics<parallel>], iteration_bounds = array<i64: 2, 1>, scalar_prefetch = 0 : i64, scratch_operands = 0 : i64, tpu.core_type = #tpu.core_type<tc>, window_params = [{transform_indices = @transform_0, window_bounds = array<i64: 1, 64, 8>}, {pipeline_mode = #tpu.pipeline_mode<synchronous>, transform_indices = @transform_1, window_bounds = array<i64: 1, 8>}, {pipeline_mode = #tpu.pipeline_mode<synchronous>, transform_indices = @transform_2, window_bounds = array<i64: 1, 8>}, {transform_indices = @transform_3, window_bounds = array<i64: 1, 8, 64>}]} {
    %c0 = arith.constant 0 : index
    %c0_0 = arith.constant 0 : index
    %c0_1 = arith.constant 0 : index
    %0 = vector.load %arg2[%c0, %c0_0, %c0_1] : memref<1x64x8xbf16, #tpu.memory_space<vmem>>, vector<1x64x8xbf16>
    %1 = vector.shape_cast %0 : vector<1x64x8xbf16> to vector<64x8xbf16>
    %2 = arith.extf %1 : vector<64x8xbf16> to vector<64x8xf32>
    %c0_2 = arith.constant 0 : index
    %c0_3 = arith.constant 0 : index
    %3 = vector.load %arg3[%c0_2, %c0_3] : memref<1x8xf32, #tpu.memory_space<vmem>>, vector<1x8xf32>
    %4 = vector.broadcast %3 : vector<1x8xf32> to vector<64x8xf32>
    %5 = arith.mulf %2, %4 : vector<64x8xf32>
    %c0_4 = arith.constant 0 : index
    %c0_5 = arith.constant 0 : index
    %6 = vector.load %arg4[%c0_4, %c0_5] : memref<1x8xf32, #tpu.memory_space<vmem>>, vector<1x8xf32>
    %7 = vector.broadcast %6 : vector<1x8xf32> to vector<64x8xf32>
    %8 = arith.addf %5, %7 : vector<64x8xf32>
    %9 = tpu.transpose %8, [1, 0] : vector<64x8xf32> -> vector<8x64xf32>
    %c0_6 = arith.constant 0 : index
    %c0_7 = arith.constant 0 : index
    %c0_8 = arith.constant 0 : index
    %10 = vector.load %arg5[%c0_6, %c0_7, %c0_8] : memref<1x8x64xf32, #tpu.memory_space<vmem>>, vector<1x8x64xf32>
    %11 = vector.shape_cast %10 : vector<1x8x64xf32> to vector<8x64xf32>
    %12 = vector.shape_cast %9 : vector<8x64xf32> to vector<1x8x64xf32>
    tpu.vector_store %arg5[%c0_6, %c0_7, %c0_8], %12 {strides = array<i32>} : memref<1x8x64xf32, #tpu.memory_space<vmem>>, vector<1x8x64xf32>,
    return
  }
  func.func @transform_0(%arg0: i32, %arg1: i32) -> (i32, i32, i32) {
    %c0_i32 = arith.constant 0 : i32
    %c0_i32_0 = arith.constant 0 : i32
    return %arg0, %arg1, %c0_i32 : i32, i32, i32
  }
  func.func @transform_1(%arg0: i32, %arg1: i32) -> (i32, i32) {
    %c0_i32 = arith.constant 0 : i32
    %c0_i32_0 = arith.constant 0 : i32
    %c0_i32_1 = arith.constant 0 : i32
    return %c0_i32, %c0_i32_0 : i32, i32
  }
  func.func @transform_2(%arg0: i32, %arg1: i32) -> (i32, i32) {
    %c0_i32 = arith.constant 0 : i32
    %c0_i32_0 = arith.constant 0 : i32
    %c0_i32_1 = arith.constant 0 : i32
    return %c0_i32, %c0_i32_0 : i32, i32
  }
  func.func @transform_3(%arg0: i32, %arg1: i32) -> (i32, i32, i32) {
    %c0_i32 = arith.constant 0 : i32
    %c0_i32_0 = arith.constant 0 : i32
    return %arg0, %c0_i32, %arg1 : i32, i32, i32
  }
}

</mosaic_0001>

<bundles_post_ra>
// kernel: downsamp_forward.3
= control target key start
LH: loop header
LB: loop body
LE: loop exit
PB: predicated region body
PF: predicated region fallthrough
CT: control target
= control target key end

     0   :  { %s463_s12 = smov 0   ;;  %s465_s13 = smov 0   ;;  %s506_s0 = inlined_call_operand.vmem [shape: bf16[2,64,8], index: 0, kind: input, shape index: {}]   ;;  %s507_s1 = inlined_call_operand.vmem [shape: f32[1,8], index: 1, kind: input, shape index: {}]   ;;  %s508_s2 = inlined_call_operand.vmem [shape: f32[1,8], index: 2, kind: input, shape index: {}]   ;;  %s509_s3 = inlined_call_operand.vmem [shape: f32[2,8,64], index: 3, kind: output, shape index: {}]  }
   0x1   :  { %s467_s14 = smov 0  }
   0x2 LB: > { %s25_s15 = sadd.s32 1, %s437_s13  ;;  %p366_p0 = scmp.ge.s32.totalorder %s441_s14, 1  ;;  %s441_s14 = sphi %s467_s14, %s13_s14   ;;  %s437_s13 = sphi %s465_s13, %s511_s13   ;;  %s433_s12 = sphi %s463_s12, %s510_s12  }
   0x3   : > { %p27_p1 = scmp.ge.s32.totalorder %s25_s15, 2  ;;  %p158_p2 = scmp.lt.s32.totalorder %s441_s14, 3 }
   0x5   : > { %s513_s15 = smov (%p27_p1, %s25_s15), 0  ;;  %p159_p3 = pnand %p366_p0, %p158_p2 }
   0x6   : > { %p189_p4 = scmp.lt.s32.totalorder (!%p159_p3), %s433_s12, 1 }
   0x7   : > { %162 = sbr.rel (%p159_p3) target bundleno = 148 (0x94), region = 32 }
   0xc   : > { %s515_s12 = smov (!%p189_p4, %s433_s12), 1  ;;  %v370_v1 = vld [vmem:[%s507_s1] ss:$0 sm:$0xff]  ;;  %vm283_vm0 = vcmask 523264  }
   0xd   : > { %s374_s16 = sshll.u32 %s515_s12, 5  ;;  %v371_v5 = vld [vmem:[%s508_s2] ss:$0 sm:$0xff]  ;;  %s369_s24 = sshll.u32 %s515_s12, 3 }
   0xe   : > { %s196_s19 = scalar_lea.vmem %s506_s0, %s374_s16  ;;  %s204_s27 = scalar_lea.vmem %s509_s3, %s369_s24 }
   0xf   : > { %v376_v0 = vld [vmem:[%s196_s19] sm:$0xff]   ;;  %v391_v2 = vld [vmem:[%s196_s19 + $0x8] sm:$0xff]   ;;  %v392_v13 = vld [vmem:[%s196_s19 + $0x10] sm:$0xff]  }
  0x10   : > { %v377_v3 = vunpack.c.l.bf16 %v376_v0  ;;  %v378_v4 = vunpack.c.h.bf16 %v376_v0  ;;  %v381_v8 = vunpack.c.l.bf16 %v391_v2  ;;  %v382_v12 = vunpack.c.h.bf16 %v391_v2  ;;  %v393_v20 = vld [vmem:[%s196_s19 + $0x18] sm:$0xff]  }
  0x11   : > { %v385_v16 = vunpack.c.l.bf16 %v392_v13  ;;  %v386_v19 = vunpack.c.h.bf16 %v392_v13  ;;  %v389_v23 = vunpack.c.l.bf16 %v393_v20  ;;  %v390_v26 = vunpack.c.h.bf16 %v393_v20 }
  0x12   : > { %v228_v6 = vmul.f32 %v377_v3, %v370_v1  ;;  %v229_v7 = vmul.f32 %v378_v4, %v370_v1  ;;  %v230_v11 = vmul.f32 %v381_v8, %v370_v1  ;;  %v231_v15 = vmul.f32 %v382_v12, %v370_v1 }
  0x13   : > { %v232_v18 = vmul.f32 %v385_v16, %v370_v1  ;;  %v233_v22 = vmul.f32 %v386_v19, %v370_v1  ;;  %v234_v25 = vmul.f32 %v389_v23, %v370_v1  ;;  %v235_v28 = vmul.f32 %v390_v26, %v370_v1 }
  0x14   : > { %v243_v9 = vadd.f32 %v371_v5, %v228_v6  ;;  %v244_v10 = vadd.f32 %v371_v5, %v229_v7  ;;  %v245_v14 = vadd.f32 %v371_v5, %v230_v11  ;;  %v246_v17 = vadd.f32 %v371_v5, %v231_v15 }
  0x15   : > { %v247_v21 = vadd.f32 %v371_v5, %v232_v18  ;;  %v248_v24 = vadd.f32 %v371_v5, %v233_v22  ;;  %v249_v27 = vadd.f32 %v371_v5, %v234_v25  ;;  %v250_v29 = vadd.f32 %v371_v5, %v235_v28 }
  0x16   : > { %251 = vxpose.xlu0.b32.start [1/8] (short) (narrow) %v243_v9, 8 }
  0x1a   : > { %252 = vxpose.xlu0.b32.cont [2/8] (short) (narrow) %v244_v10, 8 }
  0x1e   : > { %253 = vxpose.xlu0.b32.cont [3/8] (short) (narrow) %v245_v14, 8 }
  0x22   : > { %254 = vxpose.xlu0.b32.cont [4/8] (short) (narrow) %v246_v17, 8 }
  0x26   : > { %255 = vxpose.xlu0.b32.cont [5/8] (short) (narrow) %v247_v21, 8 }
  0x2a   : > { %256 = vxpose.xlu0.b32.cont [6/8] (short) (narrow) %v248_v24, 8 }
  0x2e   : > { %257 = vxpose.xlu0.b32.cont [7/8] (short) (narrow) %v249_v27, 8 }
  0x32   : > { %258 = vxpose.xlu0.b32.end [8/8] (short) (narrow) %v250_v29, 8 }
  0x92   : > { %v267_v30 = vpop.trf.xlu0 }
  0x93   : > { %284 = vst.msk [vmem:[%s204_s27] sm:$0xff] %vm283_vm0, %v267_v30 }
  0x94 PF: > { %s13_s14 = sadd.s32 1, %s441_s14   ;;  %s510_s12 = smov %s437_s13 }
  0x95   : > { %p10_p5 = scmp.ge.s32.totalorder %s13_s14, 4   ;;  %s511_s13 = smov %s513_s15 }
  0x97   :  { %12 = sbr.rel (!%p10_p5) target bundleno = 2 (0x2), region = 62 }

// kernel: downsamp_forward.2
= control target key start
LH: loop header
LB: loop body
LE: loop exit
PB: predicated region body
PF: predicated region fallthrough
CT: control target
= control target key end

     0   :  { %s3162_s18 = smov 0   ;;  %s3164_s19 = smov 0   ;;  %s3525_s0 = inlined_call_operand.vmem [shape: bf16[2,9,9,16], index: 0, kind: input, shape index: {}]   ;;  %s3526_s1 = inlined_call_operand.vmem [shape: bf16[4,16,8], index: 1, kind: input, shape index: {}]   ;;  %s3527_s2 = inlined_call_operand.vmem [shape: f32[1,8], index: 2, kind: input, shape index: {}]   ;;  %s3528_s3 = inlined_call_operand.vmem [shape: bf16[2,8,8,8], index: 3, kind: output, shape index: {0}]   ;;  %s3529_s4 = inlined_call_operand.vmem [shape: f32[2,1,1,8], index: 4, kind: output, shape index: {1}]   ;;  %s3530_s5 = inlined_call_operand.vmem [shape: f32[2,1,1,8], index: 5, kind: output, shape index: {2}]  }
   0x1   :  { %s3166_s20 = smov 0  }
   0x2 LB: > { %s28_s21 = sadd.s32 1, %s3124_s19  ;;  %p2594_p0 = scmp.ge.s32.totalorder %s3128_s20, 1  ;;  %s3128_s20 = sphi %s3166_s20, %s16_s20   ;;  %s3124_s19 = sphi %s3164_s19, %s3532_s19   ;;  %s3120_s18 = sphi %s3162_s18, %s3531_s18  }
   0x3   : > { %p30_p1 = scmp.ge.s32.totalorder %s28_s21, 2  ;;  %p210_p2 = scmp.lt.s32.totalorder %s3128_s20, 3 }
   0x5   : > { %s3534_s21 = smov (%p30_p1, %s28_s21), 0  ;;  %p211_p3 = pnand %p2594_p0, %p210_p2 }
   0x6   : > { %p254_p4 = scmp.lt.s32.totalorder (!%p211_p3), %s3120_s18, 1 }
   0x7   : > { %214 = sbr.rel (%p211_p3) target bundleno = 365 (0x16d), region = 32 }
   0xc   : > { %v3058_v0 = vld [vmem:[%s3526_s1] sm:$0xff]   ;;  %v3130_v1 = vmov 0.0   ;;  %v3059_v2 = vld [vmem:[%s3526_s1 + $0x8] sm:$0xff]   ;;  %vm3131_vm0 = vmmov 0   ;;  %s3536_s18 = smov (!%p254_p4, %s3120_s18), 1  ;;  %vm312_vm1 = vcmask 130048  }
   0xd   : > { %2845 = vmatprep.subr.bf16.mxu1 %v3130_v1  ;;  %2839 = vmatprep.subr.bf16.mxu0 %v3130_v1  ;;  %s3031_s26 = smul.u32 72, %s3536_s18  ;;  %v3062_v3 = vld [vmem:[%s3526_s1 + $0x18] sm:$0xff]   ;;  %v3061_v14 = vld [vmem:[%s3526_s1 + $0x10] sm:$0xff]   ;;  %v3065_v19 = vld [vmem:[%s3526_s1] sm:$0xff]   ;;  %s2774_s30 = sshll.u32 %s3536_s18, 5  ;;  %vm541_vm3 = vcmask 60416  }
   0xe   : > { %2846 = vmatpush3.bf16.msra.mxu1 %v3058_v0  ;;  %2847 = vmatprep.mubr.msk.bf16.mxu1 %vm3131_vm0, %v3130_v1  ;;  %v3064_v22 = vld [vmem:[%s3526_s1 + $0x8] sm:$0xff]   ;;  %v3068_v26 = vld [vmem:[%s3526_s1 + $0x18] sm:$0xff]   ;;  %v3067_v35 = vld [vmem:[%s3526_s1 + $0x10] sm:$0xff]   ;;  %s3454_s9 = scalar_lea.vmem %s3528_s3, %s2774_s30  ;;  %vm543_vm4 = vcmask 64512   ;;  %s274_s12 = scalar_lea.vmem %s3529_s4, %s3536_s18  ;;  %vm2402_vm12 = vcmask 57344  }
   0xf   : > { %2840 = vmatpush3.bf16.msra.mxu0 %v3059_v2  ;;  %2841 = vmatprep.mubr.msk.bf16.mxu0 %vm3131_vm0, %v3130_v1  ;;  %s3203_s6 = scalar_lea.vmem %s3525_s0, %s3031_s26  ;;  %v3071_v36 = vld [vmem:[%s3526_s1] sm:$0xff]   ;;  %v3070_v42 = vld [vmem:[%s3526_s1 + $0x8] sm:$0xff]   ;;  %v3074_v43 = vld [vmem:[%s3526_s1 + $0x18] sm:$0xff]   ;;  %s280_s15 = scalar_lea.vmem %s3530_s5, %s3536_s18 }
  0x10   : > { %2851 = vmatprep.subr.bf16.mxu0 %v3130_v1  ;;  %2857 = vmatprep.subr.bf16.mxu1 %v3130_v1  ;;  %v287_v4 = vld [vmem:[%s3203_s6] sm:$0xf]  ;;  %v290_v5 = vld [vmem:[%s3203_s6 + $0x4] sm:$0x1]  ;;  %v3063_v7 = vld [vmem:[%s3203_s6 + $0x8] sm:$0x1f]  }
  0x11   : > { %v2600_v6 = vcombine.low %v287_v4, %v290_v5  ;;  %2848 = vmatmul.mubr.msk.bf16.vlgmr.msra.gmra.mxu1 %vm312_vm1, %v287_v4  ;;  %v474_v10 = vshrl.u32 %v3063_v7, 16  ;;  %v476_v11 = vshll.u32 %v3063_v7, 16  ;;  %v2618_v15 = vld [vmem:[%s3203_s6 + $0x8] sm:$0xf]  ;;  %v2619_v16 = vld [vmem:[%s3203_s6 + $0xc] sm:$0x1] }
  0x12   : > { %2858 = vmatpush3.bf16.msra.mxu1 %v3062_v3  ;;  %2859 = vmatprep.mubr.msk.bf16.mxu1 %vm3131_vm0, %v3130_v1  ;;  %v2622_v20 = vcombine.low %v2618_v15, %v2619_v16  ;;  %v3069_v21 = vld [vmem:[%s3203_s6 + $0x10] sm:$0x1f]   ;;  %v2605_v25 = vld [vmem:[%s3203_s6 + $0x8] sm:$0xf]  ;;  %v3075_v38 = vld [vmem:[%s3203_s6 + $0x18] sm:$0x1f]  }
  0x13   : > { %v300_v8 = vshrl.u32 %v2600_v6, 16  ;;  %v302_v9 = vshll.u32 %v2600_v6, 16  ;;  %2869 = vmatprep.subr.bf16.mxu1 %v3130_v1  ;;  %v478_v13 = vrot.slane %v476_v11, 1  ;;  %v746_v24 = vshll.u32 %v3069_v21, 16  ;;  %v2640_v31 = vld [vmem:[%s3203_s6 + $0x10] sm:$0xf] }
  0x14   : > { %v575_v23 = vshll.u32 %v2622_v20, 16  ;;  %v573_v27 = vshrl.u32 %v2622_v20, 16  ;;  %v744_v29 = vshrl.u32 %v3069_v21, 16  ;;  %v2641_v34 = vld [vmem:[%s3203_s6 + $0x14] sm:$0x1]  ;;  %v1009_v40 = vshll.u32 %v3075_v38, 16 }
  0x15   : > { %v304_v12 = vrot.slane %v302_v9, 1  ;;  %v479_v18 = vor.u32 %v478_v13, %v474_v10  ;;  %v748_v30 = vrot.slane %v746_v24, 1  ;;  %v2644_v37 = vcombine.low %v2640_v31, %v2641_v34  ;;  %v2627_v41 = vld [vmem:[%s3203_s6 + $0x10] sm:$0xf]  ;;  %v2662_v51 = vld [vmem:[%s3203_s6 + $0x18] sm:$0xf] }
  0x16   : > { %v577_v28 = vrot.slane %v575_v23, 1  ;;  %v1007_v46 = vshrl.u32 %v3075_v38, 16  ;;  %v1011_v47 = vrot.slane %v1009_v40, 1  ;;  %v3073_v49 = vld [vmem:[%s3526_s1 + $0x10] sm:$0xff]   ;;  %v2663_v52 = vld [vmem:[%s3203_s6 + $0x1c] sm:$0x1] }
  0x17   : > { %v305_v17 = vor.u32 %v304_v12, %v300_v8  ;;  %v749_v33 = vor.u32 %v748_v30, %v744_v29  ;;  %v838_v39 = vshll.u32 %v2644_v37, 16  ;;  %v836_v44 = vshrl.u32 %v2644_v37, 16  ;;  %v3077_v53 = vld [vmem:[%s3526_s1] sm:$0xff]   ;;  %v2649_v58 = vld [vmem:[%s3203_s6 + $0x18] sm:$0xf]  ;;  %v3076_v59 = vld [vmem:[%s3526_s1 + $0x8] sm:$0xff]  }
  0x18   : > { %v578_v32 = vor.u32 %v577_v28, %v573_v27  ;;  %v1012_v50 = vor.u32 %v1011_v47, %v1007_v46  ;;  %v2666_v54 = vcombine.low %v2662_v51, %v2663_v52  ;;  %v3081_v55 = vld [vmem:[%s3203_s6 + $0x20] sm:$0x1f]   ;;  %v3080_v60 = vld [vmem:[%s3526_s1 + $0x18] sm:$0xff]   ;;  %v3079_v4 = vld [vmem:[%s3526_s1 + $0x10] sm:$0xff]  }
  0x19   : > { %2842 = vmatmul.mubr.msk.bf16.vlgmr.msra.gmra.mxu0 %vm312_vm1, %v305_v17  ;;  %2860 = vmatmul.mubr.msk.bf16.vlgmr.msra.gmra.mxu1 %vm312_vm1, %v479_v18  ;;  %v840_v45 = vrot.slane %v838_v39, 1  ;;  %v1272_v57 = vshll.u32 %v3081_v55, 16  ;;  %v1270_v63 = vshrl.u32 %v3081_v55, 16  ;;  %v2684_v5 = vld [vmem:[%s3203_s6 + $0x20] sm:$0xf]  ;;  %v3082_v13 = vld [vmem:[%s3526_s1 + $0x8] sm:$0xff]  }
  0x1a   : > { %2852 = vmatpush3.bf16.msra.mxu0 %v3061_v14  ;;  %2853 = vmatprep.mubr.msk.bf16.mxu0 %vm3131_vm0, %v3130_v1  ;;  %v1101_v56 = vshll.u32 %v2666_v54, 16  ;;  %v1099_v61 = vshrl.u32 %v2666_v54, 16  ;;  %v2685_v6 = vld [vmem:[%s3203_s6 + $0x24] sm:$0x1]  ;;  %v3087_v9 = vld [vmem:[%s3203_s6 + $0x28] sm:$0x1f]  }
  0x1b   : > { %2863 = vmatprep.subr.bf16.mxu0 %v3130_v1  ;;  %2870 = vmatpush3.bf16.msra.mxu1 %v3065_v19  ;;  %v841_v48 = vor.u32 %v840_v45, %v836_v44  ;;  %v1274_v0 = vrot.slane %v1272_v57, 1  ;;  %v3083_v7 = vld [vmem:[%s3526_s1] sm:$0xff]   ;;  %v2688_v8 = vcombine.low %v2684_v5, %v2685_v6  ;;  %v1535_v11 = vshll.u32 %v3087_v9, 16  ;;  %v3086_v14 = vld [vmem:[%s3526_s1 + $0x18] sm:$0xff]   ;;  %v3085_v21 = vld [vmem:[%s3526_s1 + $0x10] sm:$0xff]  }
  0x1c   : > { %2871 = vmatprep.mubr.msk.bf16.mxu1 %vm3131_vm0, %v3130_v1  ;;  %2881 = vmatprep.subr.bf16.mxu1 %v3130_v1  ;;  %v1103_v62 = vrot.slane %v1101_v56, 1  ;;  %v2671_v12 = vld [vmem:[%s3203_s6 + $0x20] sm:$0xf]  ;;  %v1533_v17 = vshrl.u32 %v3087_v9, 16  ;;  %v2707_v23 = vld [vmem:[%s3203_s6 + $0x2c] sm:$0x1] }
  0x1d   : > { %v1275_v3 = vor.u32 %v1274_v0, %v1270_v63  ;;  %v1364_v10 = vshll.u32 %v2688_v8, 16  ;;  %v1537_v18 = vrot.slane %v1535_v11, 1  ;;  %v3089_v24 = vld [vmem:[%s3526_s1] sm:$0xff]   ;;  %v2693_v29 = vld [vmem:[%s3203_s6 + $0x28] sm:$0xf]  ;;  %v3091_v38 = vld [vmem:[%s3526_s1 + $0x10] sm:$0xff]  }
  0x1e   : > { %v1104_v2 = vor.u32 %v1103_v62, %v1099_v61  ;;  %v3088_v30 = vld [vmem:[%s3526_s1 + $0x8] sm:$0xff]   ;;  %v2728_v39 = vld [vmem:[%s3203_s6 + $0x30] sm:$0xf]  ;;  %v2729_v40 = vld [vmem:[%s3203_s6 + $0x34] sm:$0x1] }
  0x1f   : > { %v1366_v16 = vrot.slane %v1364_v10, 1  ;;  %v1538_v20 = vor.u32 %v1537_v18, %v1533_v17  ;;  %v2715_v46 = vld [vmem:[%s3203_s6 + $0x30] sm:$0xf]  ;;  %v3094_v47 = vld [vmem:[%s3526_s1 + $0x8] sm:$0xff]   ;;  %v2750_v56 = vld [vmem:[%s3203_s6 + $0x38] sm:$0xf] }
  0x20   : > { %v3097_v55 = vld [vmem:[%s3526_s1 + $0x10] sm:$0xff]   ;;  %v2751_v57 = vld [vmem:[%s3203_s6 + $0x3c] sm:$0x1]  ;;  %v2737_v63 = vld [vmem:[%s3203_s6 + $0x38] sm:$0xf] }
  0x21   : > { %2854 = vmatmul.mubr.msk.bf16.vlgmr.msra.gmra.mxu0 %vm312_vm1, %v2605_v25  ;;  %2872 = vmatmul.mubr.msk.bf16.vlgmr.msra.gmra.mxu1 %vm312_vm1, %v2618_v15  ;;  %v1362_v15 = vshrl.u32 %v2688_v8, 16  ;;  %v3100_v0 = vld [vmem:[%s3526_s1 + $0x8] sm:$0xff]   ;;  %v3103_v9 = vld [vmem:[%s3526_s1 + $0x10] sm:$0xff]   ;;  %v2759_v10 = vld [vmem:[%s3203_s6 + $0x40] sm:$0xf] }
  0x22   : > { %2864 = vmatpush3.bf16.msra.mxu0 %v3064_v22  ;;  %2865 = vmatprep.mubr.msk.bf16.mxu0 %vm3131_vm0, %v3130_v1  ;;  %v2706_v22 = vld [vmem:[%s3203_s6 + $0x28] sm:$0xf] }
  0x23   : > { %2875 = vmatprep.subr.bf16.mxu0 %v3130_v1  ;;  %2882 = vmatpush3.bf16.msra.mxu1 %v3068_v26  ;;  %v1367_v19 = vor.u32 %v1366_v16, %v1362_v15  ;;  %v2710_v25 = vcombine.low %v2706_v22, %v2707_v23  ;;  %v3093_v26 = vld [vmem:[%s3203_s6 + $0x30] sm:$0x1f]  }
  0x24   : > { %2883 = vmatprep.mubr.msk.bf16.mxu1 %vm3131_vm0, %v3130_v1  ;;  %2893 = vmatprep.subr.bf16.mxu1 %v3130_v1  ;;  %v1798_v28 = vshll.u32 %v3093_v26, 16  ;;  %v1796_v34 = vshrl.u32 %v3093_v26, 16  ;;  %v3447_v26 = vld [vmem:[%s3527_s2] ss:$0 sm:$0xff] }
  0x25   : > { %v1627_v27 = vshll.u32 %v2710_v25, 16 }
  0x29   : > { %2866 = vmatmul.mubr.msk.bf16.vlgmr.msra.gmra.mxu0 %vm312_vm1, %v578_v32  ;;  %2884 = vmatmul.mubr.msk.bf16.vlgmr.msra.gmra.mxu1 %vm312_vm1, %v749_v33  ;;  %v1625_v32 = vshrl.u32 %v2710_v25, 16  ;;  %v1629_v33 = vrot.slane %v1627_v27, 1 }
  0x2a   : > { %2876 = vmatpush3.bf16.msra.mxu0 %v3067_v35  ;;  %2877 = vmatprep.mubr.msk.bf16.mxu0 %vm3131_vm0, %v3130_v1  ;;  %v1800_v35 = vrot.slane %v1798_v28, 1 }
  0x2b   : > { %2887 = vmatprep.subr.bf16.mxu0 %v3130_v1  ;;  %2894 = vmatpush3.bf16.msra.mxu1 %v3071_v36  ;;  %v1630_v36 = vor.u32 %v1629_v33, %v1625_v32 }
  0x2c   : > { %2895 = vmatprep.mubr.msk.bf16.mxu1 %vm3131_vm0, %v3130_v1  ;;  %2905 = vmatprep.subr.bf16.mxu1 %v3130_v1  ;;  %v1801_v37 = vor.u32 %v1800_v35, %v1796_v34 }
  0x31   : > { %2878 = vmatmul.mubr.msk.bf16.vlgmr.msra.gmra.mxu0 %vm312_vm1, %v2627_v41  ;;  %2896 = vmatmul.mubr.msk.bf16.vlgmr.msra.gmra.mxu1 %vm312_vm1, %v2640_v31  ;;  %v3092_v31 = vld [vmem:[%s3526_s1 + $0x18] sm:$0xff]   ;;  %v3095_v41 = vld [vmem:[%s3526_s1] sm:$0xff]  }
  0x32   : > { %2888 = vmatpush3.bf16.msra.mxu0 %v3070_v42  ;;  %2889 = vmatprep.mubr.msk.bf16.mxu0 %vm3131_vm0, %v3130_v1  ;;  %v2732_v42 = vcombine.low %v2728_v39, %v2729_v40 }
  0x33   : > { %2899 = vmatprep.subr.bf16.mxu0 %v3130_v1  ;;  %2906 = vmatpush3.bf16.msra.mxu1 %v3074_v43  ;;  %v3099_v43 = vld [vmem:[%s3203_s6 + $0x38] sm:$0x1f]  }
  0x34   : > { %2907 = vmatprep.mubr.msk.bf16.mxu1 %vm3131_vm0, %v3130_v1  ;;  %2917 = vmatprep.subr.bf16.mxu1 %v3130_v1  ;;  %v1890_v44 = vshll.u32 %v2732_v42, 16  ;;  %v2061_v45 = vshll.u32 %v3099_v43, 16 }
  0x36   : > { %v2063_v52 = vrot.slane %v2061_v45, 1 }
  0x39   : > { %2890 = vmatmul.mubr.msk.bf16.vlgmr.msra.gmra.mxu0 %vm312_vm1, %v841_v48  ;;  %2908 = vmatmul.mubr.msk.bf16.vlgmr.msra.gmra.mxu1 %vm312_vm1, %v1012_v50  ;;  %v3098_v48 = vld [vmem:[%s3526_s1 + $0x18] sm:$0xff]   ;;  %v1892_v50 = vrot.slane %v1890_v44, 1 }
  0x3a   : > { %2900 = vmatpush3.bf16.msra.mxu0 %v3073_v49  ;;  %2901 = vmatprep.mubr.msk.bf16.mxu0 %vm3131_vm0, %v3130_v1  ;;  %v1888_v49 = vshrl.u32 %v2732_v42, 16 }
  0x3b   : > { %2911 = vmatprep.subr.bf16.mxu0 %v3130_v1  ;;  %2918 = vmatpush3.bf16.msra.mxu1 %v3077_v53 }
  0x3c   : > { %2919 = vmatprep.mubr.msk.bf16.mxu1 %vm3131_vm0, %v3130_v1  ;;  %2929 = vmatprep.subr.bf16.mxu1 %v3130_v1  ;;  %v1893_v53 = vor.u32 %v1892_v50, %v1888_v49 }
  0x41   : > { %2902 = vmatmul.mubr.msk.bf16.vlgmr.msra.gmra.mxu0 %vm312_vm1, %v2649_v58  ;;  %2920 = vmatmul.mubr.msk.bf16.vlgmr.msra.gmra.mxu1 %vm312_vm1, %v2662_v51  ;;  %v2059_v51 = vshrl.u32 %v3099_v43, 16  ;;  %v3101_v58 = vld [vmem:[%s3526_s1] sm:$0xff]  }
  0x42   : > { %2912 = vmatpush3.bf16.msra.mxu0 %v3076_v59  ;;  %2913 = vmatprep.mubr.msk.bf16.mxu0 %vm3131_vm0, %v3130_v1  ;;  %v2754_v59 = vcombine.low %v2750_v56, %v2751_v57 }
  0x43   : > { %2923 = vmatprep.subr.bf16.mxu0 %v3130_v1  ;;  %2930 = vmatpush3.bf16.msra.mxu1 %v3080_v60  ;;  %v2064_v54 = vor.u32 %v2063_v52, %v2059_v51  ;;  %v3105_v60 = vld [vmem:[%s3203_s6 + $0x40] sm:$0x1f]  }
  0x44   : > { %2931 = vmatprep.mubr.msk.bf16.mxu1 %vm3131_vm0, %v3130_v1  ;;  %2941 = vmatprep.subr.bf16.mxu1 %v3130_v1  ;;  %v2153_v61 = vshll.u32 %v2754_v59, 16  ;;  %v2324_v62 = vshll.u32 %v3105_v60, 16 }
  0x46   : > { %v2326_v6 = vrot.slane %v2324_v62, 1 }
  0x49   : > { %2914 = vmatmul.mubr.msk.bf16.vlgmr.msra.gmra.mxu0 %vm312_vm1, %v1104_v2  ;;  %2932 = vmatmul.mubr.msk.bf16.vlgmr.msra.gmra.mxu1 %vm312_vm1, %v1275_v3  ;;  %v3104_v2 = vld [vmem:[%s3526_s1 + $0x18] sm:$0xff]   ;;  %v2151_v3 = vshrl.u32 %v2754_v59, 16 }
  0x4a   : > { %2924 = vmatpush3.bf16.msra.mxu0 %v3079_v4  ;;  %2925 = vmatprep.mubr.msk.bf16.mxu0 %vm3131_vm0, %v3130_v1  ;;  %v2155_v4 = vrot.slane %v2153_v61, 1 }
  0x4b   : > { %2935 = vmatprep.subr.bf16.mxu0 %v3130_v1  ;;  %2942 = vmatpush3.bf16.msra.mxu1 %v3083_v7 }
  0x4c   : > { %2943 = vmatprep.mubr.msk.bf16.mxu1 %vm3131_vm0, %v3130_v1  ;;  %2953 = vmatprep.subr.bf16.mxu1 %v3130_v1  ;;  %v2156_v7 = vor.u32 %v2155_v4, %v2151_v3 }
  0x51   : > { %2926 = vmatmul.mubr.msk.bf16.vlgmr.msra.gmra.mxu0 %vm312_vm1, %v2671_v12  ;;  %2944 = vmatmul.mubr.msk.bf16.vlgmr.msra.gmra.mxu1 %vm312_vm1, %v2684_v5  ;;  %v2322_v5 = vshrl.u32 %v3105_v60, 16 }
  0x52   : > { %2936 = vmatpush3.bf16.msra.mxu0 %v3082_v13  ;;  %2937 = vmatprep.mubr.msk.bf16.mxu0 %vm3131_vm0, %v3130_v1 }
  0x53   : > { %2947 = vmatprep.subr.bf16.mxu0 %v3130_v1  ;;  %2954 = vmatpush3.bf16.msra.mxu1 %v3086_v14  ;;  %v2327_v8 = vor.u32 %v2326_v6, %v2322_v5 }
  0x54   : > { %2955 = vmatprep.mubr.msk.bf16.mxu1 %vm3131_vm0, %v3130_v1  ;;  %2965 = vmatprep.subr.bf16.mxu1 %v3130_v1 }
  0x59   : > { %2938 = vmatmul.mubr.msk.bf16.vlgmr.msra.gmra.mxu0 %vm312_vm1, %v1367_v19  ;;  %2956 = vmatmul.mubr.msk.bf16.vlgmr.msra.gmra.mxu1 %vm312_vm1, %v1538_v20 }
  0x5a   : > { %2948 = vmatpush3.bf16.msra.mxu0 %v3085_v21  ;;  %2949 = vmatprep.mubr.msk.bf16.mxu0 %vm3131_vm0, %v3130_v1 }
  0x5b   : > { %2959 = vmatprep.subr.bf16.mxu0 %v3130_v1  ;;  %2966 = vmatpush3.bf16.msra.mxu1 %v3089_v24 }
  0x5c   : > { %2967 = vmatprep.mubr.msk.bf16.mxu1 %vm3131_vm0, %v3130_v1  ;;  %2977 = vmatprep.subr.bf16.mxu1 %v3130_v1 }
  0x61   : > { %2950 = vmatmul.mubr.msk.bf16.vlgmr.msra.gmra.mxu0 %vm312_vm1, %v2693_v29  ;;  %2968 = vmatmul.mubr.msk.bf16.vlgmr.msra.gmra.mxu1 %vm312_vm1, %v2706_v22 }
  0x62   : > { %2960 = vmatpush3.bf16.msra.mxu0 %v3088_v30  ;;  %2961 = vmatprep.mubr.msk.bf16.mxu0 %vm3131_vm0, %v3130_v1 }
  0x63   : > { %2971 = vmatprep.subr.bf16.mxu0 %v3130_v1  ;;  %2978 = vmatpush3.bf16.msra.mxu1 %v3092_v31 }
  0x64   : > { %2979 = vmatprep.mubr.msk.bf16.mxu1 %vm3131_vm0, %v3130_v1  ;;  %2989 = vmatprep.subr.bf16.mxu1 %v3130_v1 }
  0x69   : > { %2962 = vmatmul.mubr.msk.bf16.vlgmr.msra.gmra.mxu0 %vm312_vm1, %v1630_v36  ;;  %2980 = vmatmul.mubr.msk.bf16.vlgmr.msra.gmra.mxu1 %vm312_vm1, %v1801_v37 }
  0x6a   : > { %2972 = vmatpush3.bf16.msra.mxu0 %v3091_v38  ;;  %2973 = vmatprep.mubr.msk.bf16.mxu0 %vm3131_vm0, %v3130_v1 }
  0x6b   : > { %2983 = vmatprep.subr.bf16.mxu0 %v3130_v1  ;;  %2990 = vmatpush3.bf16.msra.mxu1 %v3095_v41 }
  0x6c   : > { %2991 = vmatprep.mubr.msk.bf16.mxu1 %vm3131_vm0, %v3130_v1  ;;  %3001 = vmatprep.subr.bf16.mxu1 %v3130_v1 }
  0x71   : > { %2974 = vmatmul.mubr.msk.bf16.vlgmr.msra.gmra.mxu0 %vm312_vm1, %v2715_v46  ;;  %2992 = vmatmul.mubr.msk.bf16.vlgmr.msra.gmra.mxu1 %vm312_vm1, %v2728_v39 }
  0x72   : > { %2984 = vmatpush3.bf16.msra.mxu0 %v3094_v47  ;;  %2985 = vmatprep.mubr.msk.bf16.mxu0 %vm3131_vm0, %v3130_v1 }
  0x73   : > { %2995 = vmatprep.subr.bf16.mxu0 %v3130_v1  ;;  %3002 = vmatpush3.bf16.msra.mxu1 %v3098_v48 }
  0x74   : > { %3003 = vmatprep.mubr.msk.bf16.mxu1 %vm3131_vm0, %v3130_v1  ;;  %3013 = vmatprep.subr.bf16.mxu1 %v3130_v1 }
  0x79   : > { %2986 = vmatmul.mubr.msk.bf16.vlgmr.msra.gmra.mxu0 %vm312_vm1, %v1893_v53  ;;  %3004 = vmatmul.mubr.msk.bf16.vlgmr.msra.gmra.mxu1 %vm312_vm1, %v2064_v54 }
  0x7a   : > { %2996 = vmatpush3.bf16.msra.mxu0 %v3097_v55  ;;  %2997 = vmatprep.mubr.msk.bf16.mxu0 %vm3131_vm0, %v3130_v1 }
  0x7b   : > { %3007 = vmatprep.subr.bf16.mxu0 %v3130_v1  ;;  %3014 = vmatpush3.bf16.msra.mxu1 %v3101_v58 }
  0x7c   : > { %3015 = vmatprep.mubr.msk.bf16.mxu1 %vm3131_vm0, %v3130_v1  ;;  %3025 = vmatprep.subr.bf16.mxu1 %v3130_v1 }
  0x81   : > { %2998 = vmatmul.mubr.msk.bf16.vlgmr.msra.gmra.mxu0 %vm312_vm1, %v2737_v63  ;;  %3016 = vmatmul.mubr.msk.bf16.vlgmr.msra.gmra.mxu1 %vm312_vm1, %v2750_v56 }
  0x82   : > { %3008 = vmatpush3.bf16.msra.mxu0 %v3100_v0  ;;  %3009 = vmatprep.mubr.msk.bf16.mxu0 %vm3131_vm0, %v3130_v1 }
  0x83   : > { %3019 = vmatprep.subr.bf16.mxu0 %v3130_v1  ;;  %3026 = vmatpush3.bf16.msra.mxu1 %v3104_v2 }
  0x84   : > { %3027 = vmatprep.mubr.msk.bf16.mxu1 %vm3131_vm0, %v3130_v1 }
  0x89   : > { %3010 = vmatmul.mubr.msk.bf16.vlgmr.msra.gmra.mxu0 %vm312_vm1, %v2156_v7  ;;  %3028 = vmatmul.mubr.msk.bf16.vlgmr.msra.gmra.mxu1 %vm312_vm1, %v2327_v8 }
  0x8a   : > { %3020 = vmatpush3.bf16.msra.mxu0 %v3103_v9  ;;  %3021 = vmatprep.mubr.msk.bf16.mxu0 %vm3131_vm0, %v3130_v1 }
  0x91   : > { %3022 = vmatmul.mubr.msk.bf16.vlgmr.msra.gmra.mxu0 %vm312_vm1, %v2759_v10 }
  0xd1   : > { %v399_v11 = vpop.f32.mrf.mxu1 }
  0xd3   : > { %v2849_v12 = vpop.f32.mrf.mxu1 }
  0xd5   : > { %v402_v13 = vpop.f32.mrf.mxu1 }
  0xd7   : > { %v2850_v14 = vpop.f32.mrf.mxu1 }
  0xd9   : > { %v350_v15 = vpop.f32.mrf.mxu0  ;;  %v523_v16 = vpop.f32.mrf.mxu1 }
  0xda   : > { %v400_v23 = vadd.f32 %v399_v11, %v350_v15 }
  0xdb   : > { %v2843_v17 = vpop.f32.mrf.mxu0  ;;  %v2861_v18 = vpop.f32.mrf.mxu1 }
  0xdd   : > { %v353_v19 = vpop.f32.mrf.mxu0  ;;  %v526_v20 = vpop.f32.mrf.mxu1 }
  0xdf   : > { %v2844_v21 = vpop.f32.mrf.mxu0  ;;  %v2862_v22 = vpop.f32.mrf.mxu1 }
  0xe1   : > { %v456_v24 = vpop.f32.mrf.mxu0  ;;  %v671_v25 = vpop.f32.mrf.mxu1 }
  0xe2   : > { %v462_v1 = vadd.f32 %v456_v24, %v400_v23 }
  0xe3   : > { %v2855_v27 = vpop.f32.mrf.mxu0  ;;  %v2873_v28 = vpop.f32.mrf.mxu1 }
  0xe4   : > { %v529_v29 = vadd.f32 %v523_v16, %v462_v1 }
  0xe5   : > { %v459_v30 = vpop.f32.mrf.mxu0  ;;  %v674_v31 = vpop.f32.mrf.mxu1 }
  0xe6   : > { %v536_v32 = vadd.f32 %v3447_v26, %v529_v29 }
  0xe7   : > { %v2856_v33 = vpop.f32.mrf.mxu0  ;;  %v2874_v34 = vpop.f32.mrf.mxu1 }
  0xe8   : > { %vm537_vm2 = vcmp.gt.f32.partialorder %v536_v32, 0.0  ;;  %v538_v35 = vmul.f32 0.01, %v536_v32 }
  0xe9   : > { %v622_v36 = vpop.f32.mrf.mxu0  ;;  %v793_v37 = vpop.f32.mrf.mxu1 }
  0xea   : > { %v539_v38 = vsel %vm537_vm2, %v536_v32, %v538_v35  ;;  %v672_v49 = vadd.f32 %v671_v25, %v622_v36 }
  0xeb   : > { %v540_v39 = vpack.c.bf16 %v539_v38, %v539_v38  ;;  %v2867_v40 = vpop.f32.mrf.mxu0  ;;  %v2885_v41 = vpop.f32.mrf.mxu1  ;;  %v552_v42 = vmul.f32 %v539_v38, %v539_v38  ;;  %v544_v45 = vsel %vm543_vm4, %v539_v38, 0.0 }
  0xec   : > { %v545_v52 = vrot.slane %v544_v45, 4 }
  0xed   : > { %542 = vst.msk [vmem:[%s3454_s9] sm:$0xf] %vm541_vm3, %v540_v39  ;;  %v625_v43 = vpop.f32.mrf.mxu0  ;;  %v796_v44 = vpop.f32.mrf.mxu1  ;;  %v553_v48 = vsel %vm543_vm4, %v552_v42, 0.0 }
  0xee   : > { %v554_v54 = vrot.slane %v553_v48, 4  ;;  %v546_v60 = vadd.f32 %v545_v52, %v544_v45 }
  0xef   : > { %v2868_v46 = vpop.f32.mrf.mxu0  ;;  %v2886_v47 = vpop.f32.mrf.mxu1 }
  0xf0   : > { %v555_v62 = vadd.f32 %v554_v54, %v553_v48  ;;  %v547_v5 = vrot.slane %v546_v60, 2 }
  0xf1   : > { %v727_v50 = vpop.f32.mrf.mxu0  ;;  %v934_v51 = vpop.f32.mrf.mxu1 }
  0xf2   : > { %v733_v53 = vadd.f32 %v727_v50, %v672_v49  ;;  %v556_v7 = vrot.slane %v555_v62, 2  ;;  %v548_v17 = vadd.f32 %v547_v5, %v546_v60 }
  0xf3   : > { %v2879_v55 = vpop.f32.mrf.mxu0  ;;  %v2897_v56 = vpop.f32.mrf.mxu1 }
  0xf4   : > { %v799_v57 = vadd.f32 %v793_v37, %v733_v53  ;;  %v557_v20 = vadd.f32 %v556_v7, %v555_v62  ;;  %v549_v28 = vrot.slane %v548_v17, 1 }
  0xf5   : > { %v730_v58 = vpop.f32.mrf.mxu0  ;;  %v937_v59 = vpop.f32.mrf.mxu1 }
  0xf6   : > { %v800_v61 = vadd.f32 %v3447_v26, %v799_v57  ;;  %v558_v32 = vrot.slane %v557_v20, 1  ;;  %v550_v40 = vadd.f32 %v549_v28, %v548_v17 }
  0xf7   : > { %v2880_v63 = vpop.f32.mrf.mxu0  ;;  %v2898_v0 = vpop.f32.mrf.mxu1 }
  0xf8   : > { %vm801_vm5 = vcmp.gt.f32.partialorder %v800_v61, 0.0  ;;  %v802_v2 = vmul.f32 0.01, %v800_v61  ;;  %v559_v44 = vadd.f32 %v558_v32, %v557_v20 }
  0xf9   : > { %v885_v3 = vpop.f32.mrf.mxu0  ;;  %v1056_v4 = vpop.f32.mrf.mxu1 }
  0xfa   : > { %v803_v6 = vsel %vm801_vm5, %v800_v61, %v802_v2  ;;  %v935_v25 = vadd.f32 %v934_v51, %v885_v3 }
  0xfb   : > { %v804_v8 = vpack.c.bf16 %v803_v6, %v803_v6  ;;  %v807_v9 = vsel %vm543_vm4, %v803_v6, 0.0  ;;  %v815_v10 = vmul.f32 %v803_v6, %v803_v6  ;;  %v2891_v11 = vpop.f32.mrf.mxu0  ;;  %v2909_v12 = vpop.f32.mrf.mxu1 }
  0xfc   : > { %v808_v13 = vrot.slane %v807_v9, 4 }
  0xfd   : > { %2639 = vst.msk [vmem:[%s3454_s9 + $0x4] sm:$0xf] %vm541_vm3, %v804_v8  ;;  %v816_v14 = vsel %vm543_vm4, %v815_v10, 0.0  ;;  %v888_v15 = vpop.f32.mrf.mxu0  ;;  %v1059_v16 = vpop.f32.mrf.mxu1 }
  0xfe   : > { %v809_v18 = vadd.f32 %v808_v13, %v807_v9  ;;  %v817_v19 = vrot.slane %v816_v14, 4 }
  0xff   : > { %v2892_v21 = vpop.f32.mrf.mxu0  ;;  %v2910_v22 = vpop.f32.mrf.mxu1 }
 0x100   : > { %v810_v23 = vrot.slane %v809_v18, 2  ;;  %v818_v24 = vadd.f32 %v817_v19, %v816_v14 }
 0x101   : > { %v990_v1 = vpop.f32.mrf.mxu0  ;;  %v1197_v27 = vpop.f32.mrf.mxu1 }
 0x102   : > { %v811_v29 = vadd.f32 %v810_v23, %v809_v18  ;;  %v819_v30 = vrot.slane %v818_v24, 2  ;;  %v996_v31 = vadd.f32 %v990_v1, %v935_v25 }
 0x103   : > { %v2903_v33 = vpop.f32.mrf.mxu0  ;;  %v2921_v34 = vpop.f32.mrf.mxu1 }
 0x104   : > { %v812_v35 = vrot.slane %v811_v29, 1  ;;  %v820_v36 = vadd.f32 %v819_v30, %v818_v24  ;;  %v1062_v37 = vadd.f32 %v1056_v4, %v996_v31 }
 0x105   : > { %v993_v38 = vpop.f32.mrf.mxu0  ;;  %v1200_v39 = vpop.f32.mrf.mxu1 }
 0x106   : > { %v813_v41 = vadd.f32 %v812_v35, %v811_v29  ;;  %v821_v42 = vrot.slane %v820_v36, 1  ;;  %v1063_v43 = vadd.f32 %v3447_v26, %v1062_v37 }
 0x107   : > { %v2904_v45 = vpop.f32.mrf.mxu0  ;;  %v2922_v46 = vpop.f32.mrf.mxu1 }
 0x108   : > { %v814_v47 = vadd.f32 %v813_v41, %v550_v40  ;;  %v822_v48 = vadd.f32 %v821_v42, %v820_v36  ;;  %vm1064_vm6 = vcmp.gt.f32.partialorder %v1063_v43, 0.0  ;;  %v1065_v49 = vmul.f32 0.01, %v1063_v43 }
 0x109   : > { %v1148_v50 = vpop.f32.mrf.mxu0  ;;  %v1319_v51 = vpop.f32.mrf.mxu1 }
 0x10a   : > { %v823_v52 = vadd.f32 %v822_v48, %v559_v44  ;;  %v1066_v53 = vsel %vm1064_vm6, %v1063_v43, %v1065_v49  ;;  %v1198_v6 = vadd.f32 %v1197_v27, %v1148_v50 }
 0x10b   : > { %v1067_v54 = vpack.c.bf16 %v1066_v53, %v1066_v53  ;;  %v1070_v55 = vsel %vm543_vm4, %v1066_v53, 0.0  ;;  %v1078_v56 = vmul.f32 %v1066_v53, %v1066_v53  ;;  %v2915_v57 = vpop.f32.mrf.mxu0  ;;  %v2933_v58 = vpop.f32.mrf.mxu1 }
 0x10c   : > { %v1071_v59 = vrot.slane %v1070_v55, 4 }
 0x10d   : > { %2661 = vst.msk [vmem:[%s3454_s9 + $0x8] sm:$0xf] %vm541_vm3, %v1067_v54  ;;  %v1079_v60 = vsel %vm543_vm4, %v1078_v56, 0.0  ;;  %v1151_v61 = vpop.f32.mrf.mxu0  ;;  %v1322_v62 = vpop.f32.mrf.mxu1 }
 0x10e   : > { %v1072_v63 = vadd.f32 %v1071_v59, %v1070_v55  ;;  %v1080_v0 = vrot.slane %v1079_v60, 4 }
 0x10f   : > { %v2916_v2 = vpop.f32.mrf.mxu0  ;;  %v2934_v3 = vpop.f32.mrf.mxu1 }
 0x110   : > { %v1073_v4 = vrot.slane %v1072_v63, 2  ;;  %v1081_v5 = vadd.f32 %v1080_v0, %v1079_v60 }
 0x111   : > { %v1253_v7 = vpop.f32.mrf.mxu0  ;;  %v1460_v8 = vpop.f32.mrf.mxu1 }
 0x112   : > { %v1074_v9 = vadd.f32 %v1073_v4, %v1072_v63  ;;  %v1082_v10 = vrot.slane %v1081_v5, 2  ;;  %v1259_v11 = vadd.f32 %v1253_v7, %v1198_v6 }
 0x113   : > { %v2927_v12 = vpop.f32.mrf.mxu0  ;;  %v2945_v13 = vpop.f32.mrf.mxu1 }
 0x114   : > { %v1075_v14 = vrot.slane %v1074_v9, 1  ;;  %v1083_v15 = vadd.f32 %v1082_v10, %v1081_v5  ;;  %v1325_v16 = vadd.f32 %v1319_v51, %v1259_v11 }
 0x115   : > { %v1256_v17 = vpop.f32.mrf.mxu0  ;;  %v1463_v18 = vpop.f32.mrf.mxu1 }
 0x116   : > { %v1076_v19 = vadd.f32 %v1075_v14, %v1074_v9  ;;  %v1084_v20 = vrot.slane %v1083_v15, 1  ;;  %v1326_v21 = vadd.f32 %v3447_v26, %v1325_v16 }
 0x117   : > { %v2928_v22 = vpop.f32.mrf.mxu0  ;;  %v2946_v23 = vpop.f32.mrf.mxu1 }
 0x118   : > { %v3471_v24 = vadd.f32 %v1076_v19, %v814_v47  ;;  %v1085_v25 = vadd.f32 %v1084_v20, %v1083_v15  ;;  %vm1327_vm7 = vcmp.gt.f32.partialorder %v1326_v21, 0.0  ;;  %v1328_v1 = vmul.f32 0.01, %v1326_v21 }
 0x119   : > { %v1411_v27 = vpop.f32.mrf.mxu0  ;;  %v1582_v28 = vpop.f32.mrf.mxu1 }
 0x11a   : > { %v3473_v29 = vadd.f32 %v1085_v25, %v823_v52  ;;  %v3475_v30 = vsel %vm1327_vm7, %v1326_v21, %v1328_v1  ;;  %v1461_v38 = vadd.f32 %v1460_v8, %v1411_v27 }
 0x11b   : > { %v1330_v31 = vpack.c.bf16 %v3475_v30, %v3475_v30  ;;  %v2939_v32 = vpop.f32.mrf.mxu0  ;;  %v2957_v33 = vpop.f32.mrf.mxu1  ;;  %v1341_v25 = vmul.f32 %v3475_v30, %v3475_v30  ;;  %v1333_v27 = vsel %vm543_vm4, %v3475_v30, 0.0 }
 0x11d   : > { %2683 = vst.msk [vmem:[%s3454_s9 + $0xc] sm:$0xf] %vm541_vm3, %v1330_v31  ;;  %v1414_v34 = vpop.f32.mrf.mxu0  ;;  %v1585_v35 = vpop.f32.mrf.mxu1 }
 0x11f   : > { %v2940_v36 = vpop.f32.mrf.mxu0  ;;  %v2958_v37 = vpop.f32.mrf.mxu1 }
 0x120   : > { %v1334_v36 = vrot.slane %v1333_v27, 4  ;;  %v1342_v37 = vsel %vm543_vm4, %v1341_v25, 0.0 }
 0x121   : > { %v1516_v39 = vpop.f32.mrf.mxu0  ;;  %v1723_v40 = vpop.f32.mrf.mxu1 }
 0x122   : > { %v1522_v41 = vadd.f32 %v1516_v39, %v1461_v38 }
 0x123   : > { %v2951_v42 = vpop.f32.mrf.mxu0  ;;  %v2969_v43 = vpop.f32.mrf.mxu1 }
 0x124   : > { %v1588_v44 = vadd.f32 %v1582_v28, %v1522_v41 }
 0x125   : > { %v1519_v45 = vpop.f32.mrf.mxu0  ;;  %v1726_v46 = vpop.f32.mrf.mxu1 }
 0x126   : > { %v1589_v47 = vadd.f32 %v3447_v26, %v1588_v44  ;;  %v1343_v44 = vrot.slane %v1342_v37, 4 }
 0x127   : > { %v2952_v48 = vpop.f32.mrf.mxu0  ;;  %v2970_v49 = vpop.f32.mrf.mxu1 }
 0x128   : > { %vm1590_vm8 = vcmp.gt.f32.partialorder %v1589_v47, 0.0  ;;  %v1591_v50 = vmul.f32 0.01, %v1589_v47  ;;  %v1335_v49 = vadd.f32 %v1334_v36, %v1333_v27 }
 0x129   : > { %v1674_v51 = vpop.f32.mrf.mxu0  ;;  %v1845_v52 = vpop.f32.mrf.mxu1 }
 0x12a   : > { %v1592_v53 = vsel %vm1590_vm8, %v1589_v47, %v1591_v50  ;;  %v1724_v61 = vadd.f32 %v1723_v40, %v1674_v51 }
 0x12b   : > { %v1593_v54 = vpack.c.bf16 %v1592_v53, %v1592_v53  ;;  %v2963_v55 = vpop.f32.mrf.mxu0  ;;  %v2981_v56 = vpop.f32.mrf.mxu1  ;;  %v1604_v28 = vmul.f32 %v1592_v53, %v1592_v53  ;;  %v1596_v38 = vsel %vm543_vm4, %v1592_v53, 0.0 }
 0x12c   : > { %v1597_v45 = vrot.slane %v1596_v38, 4 }
 0x12d   : > { %2705 = vst.msk [vmem:[%s3454_s9 + $0x10] sm:$0xf] %vm541_vm3, %v1593_v54  ;;  %v1677_v57 = vpop.f32.mrf.mxu0  ;;  %v1848_v58 = vpop.f32.mrf.mxu1  ;;  %v1605_v40 = vsel %vm543_vm4, %v1604_v28, 0.0 }
 0x12e   : > { %v1606_v50 = vrot.slane %v1605_v40, 4 }
 0x12f   : > { %v2964_v59 = vpop.f32.mrf.mxu0  ;;  %v2982_v60 = vpop.f32.mrf.mxu1 }
 0x130   : > { %v1344_v59 = vadd.f32 %v1343_v44, %v1342_v37  ;;  %v1598_v60 = vadd.f32 %v1597_v45, %v1596_v38 }
 0x131   : > { %v1779_v62 = vpop.f32.mrf.mxu0  ;;  %v1986_v63 = vpop.f32.mrf.mxu1 }
 0x132   : > { %v1785_v0 = vadd.f32 %v1779_v62, %v1724_v61 }
 0x133   : > { %v2975_v2 = vpop.f32.mrf.mxu0  ;;  %v2993_v3 = vpop.f32.mrf.mxu1 }
 0x134   : > { %v1851_v4 = vadd.f32 %v1845_v52, %v1785_v0  ;;  %v1336_v0 = vrot.slane %v1335_v49, 2 }
 0x135   : > { %v1782_v5 = vpop.f32.mrf.mxu0  ;;  %v1989_v6 = vpop.f32.mrf.mxu1 }
 0x136   : > { %v1852_v7 = vadd.f32 %v3447_v26, %v1851_v4  ;;  %v1607_v4 = vadd.f32 %v1606_v50, %v1605_v40 }
 0x137   : > { %v2976_v8 = vpop.f32.mrf.mxu0  ;;  %v2994_v9 = vpop.f32.mrf.mxu1 }
 0x138   : > { %vm1853_vm9 = vcmp.gt.f32.partialorder %v1852_v7, 0.0  ;;  %v1854_v10 = vmul.f32 0.01, %v1852_v7 }
 0x139   : > { %v1937_v11 = vpop.f32.mrf.mxu0  ;;  %v2108_v12 = vpop.f32.mrf.mxu1 }
 0x13a   : > { %v1855_v13 = vsel %vm1853_vm9, %v1852_v7, %v1854_v10  ;;  %v1987_v21 = vadd.f32 %v1986_v63, %v1937_v11  ;;  %v1345_v10 = vrot.slane %v1344_v59, 2  ;;  %v1599_v11 = vrot.slane %v1598_v60, 2 }
 0x13b   : > { %v1856_v14 = vpack.c.bf16 %v1855_v13, %v1855_v13  ;;  %v2987_v15 = vpop.f32.mrf.mxu0  ;;  %v3005_v16 = vpop.f32.mrf.mxu1  ;;  %v1867_v41 = vmul.f32 %v1855_v13, %v1855_v13  ;;  %v1859_v46 = vsel %vm543_vm4, %v1855_v13, 0.0  ;;  %v1337_v13 = vadd.f32 %v1336_v0, %v1335_v49 }
 0x13c   : > { %v1860_v58 = vrot.slane %v1859_v46, 4  ;;  %v1600_v25 = vadd.f32 %v1599_v11, %v1598_v60 }
 0x13d   : > { %2727 = vst.msk [vmem:[%s3454_s9 + $0x14] sm:$0xf] %vm541_vm3, %v1856_v14  ;;  %v1940_v17 = vpop.f32.mrf.mxu0  ;;  %v2111_v18 = vpop.f32.mrf.mxu1  ;;  %v1868_v52 = vsel %vm543_vm4, %v1867_v41, 0.0  ;;  %v1338_v27 = vrot.slane %v1337_v13, 1 }
 0x13e   : > { %v1869_v2 = vrot.slane %v1868_v52, 4  ;;  %v1861_v7 = vadd.f32 %v1860_v58, %v1859_v46  ;;  %v1608_v17 = vrot.slane %v1607_v4, 2  ;;  %v1601_v38 = vrot.slane %v1600_v25, 1 }
 0x13f   : > { %v2988_v19 = vpop.f32.mrf.mxu0  ;;  %v3006_v20 = vpop.f32.mrf.mxu1 }
 0x140   : > { %v1870_v14 = vadd.f32 %v1869_v2, %v1868_v52  ;;  %v1862_v19 = vrot.slane %v1861_v7, 2  ;;  %v1602_v49 = vadd.f32 %v1601_v38, %v1600_v25 }
 0x141   : > { %v2042_v22 = vpop.f32.mrf.mxu0  ;;  %v2249_v23 = vpop.f32.mrf.mxu1 }
 0x142   : > { %v2048_v1 = vadd.f32 %v2042_v22, %v1987_v21  ;;  %v1346_v22 = vadd.f32 %v1345_v10, %v1344_v59  ;;  %v1871_v28 = vrot.slane %v1870_v14, 2 }
 0x143   : > { %v2999_v31 = vpop.f32.mrf.mxu0  ;;  %v3017_v32 = vpop.f32.mrf.mxu1 }
 0x144   : > { %v2114_v33 = vadd.f32 %v2108_v12, %v2048_v1  ;;  %v1609_v32 = vadd.f32 %v1608_v17, %v1607_v4  ;;  %v1347_v37 = vrot.slane %v1346_v22, 1  ;;  %v1872_v40 = vadd.f32 %v1871_v28, %v1870_v14 }
 0x145   : > { %v2045_v34 = vpop.f32.mrf.mxu0  ;;  %v2252_v35 = vpop.f32.mrf.mxu1 }
 0x146   : > { %v2115_v39 = vadd.f32 %v3447_v26, %v2114_v33  ;;  %v1863_v34 = vadd.f32 %v1862_v19, %v1861_v7 }
 0x147   : > { %v3000_v42 = vpop.f32.mrf.mxu0  ;;  %v3018_v43 = vpop.f32.mrf.mxu1 }
 0x148   : > { %vm2116_vm10 = vcmp.gt.f32.partialorder %v2115_v39, 0.0  ;;  %v2117_v30 = vmul.f32 0.01, %v2115_v39  ;;  %v1610_v43 = vrot.slane %v1609_v32, 1  ;;  %v1864_v46 = vrot.slane %v1863_v34, 1 }
 0x149   : > { %v2200_v47 = vpop.f32.mrf.mxu0  ;;  %v2371_v48 = vpop.f32.mrf.mxu1 }
 0x14a   : > { %v2118_v51 = vsel %vm2116_vm10, %v2115_v39, %v2117_v30  ;;  %v2250_v9 = vadd.f32 %v2249_v23, %v2200_v47  ;;  %v1339_v39 = vadd.f32 %v1338_v27, %v1337_v13 }
 0x14b   : > { %v2119_v53 = vpack.c.bf16 %v2118_v51, %v2118_v51  ;;  %v2122_v54 = vsel %vm543_vm4, %v2118_v51, 0.0  ;;  %v2130_v55 = vmul.f32 %v2118_v51, %v2118_v51  ;;  %v3011_v56 = vpop.f32.mrf.mxu0  ;;  %v3029_v57 = vpop.f32.mrf.mxu1  ;;  %v1873_v51 = vrot.slane %v1872_v40, 1 }
 0x14c   : > { %v2123_v3 = vrot.slane %v2122_v54, 4  ;;  %v1611_v56 = vadd.f32 %v1610_v43, %v1609_v32  ;;  %v1865_v57 = vadd.f32 %v1864_v46, %v1863_v34 }
 0x14d   : > { %2749 = vst.msk [vmem:[%s3454_s9 + $0x18] sm:$0xf] %vm541_vm3, %v2119_v53  ;;  %v2131_v61 = vsel %vm543_vm4, %v2130_v55, 0.0  ;;  %v2203_v62 = vpop.f32.mrf.mxu0  ;;  %v2374_v63 = vpop.f32.mrf.mxu1  ;;  %v1340_v55 = vadd.f32 %v1339_v39, %v3471_v24 }
 0x14e   : > { %v2132_v8 = vrot.slane %v2131_v61, 4  ;;  %v2124_v15 = vadd.f32 %v2123_v3, %v2122_v54  ;;  %v1874_v63 = vadd.f32 %v1873_v51, %v1872_v40 }
 0x14f   : > { %v3012_v5 = vpop.f32.mrf.mxu0  ;;  %v3030_v6 = vpop.f32.mrf.mxu1  ;;  %v1603_v62 = vadd.f32 %v1602_v49, %v1340_v55 }
 0x150   : > { %v2133_v20 = vadd.f32 %v2132_v8, %v2131_v61  ;;  %v2125_v31 = vrot.slane %v2124_v15, 2 }
 0x151   : > { %v2305_v12 = vpop.f32.mrf.mxu0  ;;  %v1866_v5 = vadd.f32 %v1865_v57, %v1603_v62 }
 0x152   : > { %v2311_v16 = vadd.f32 %v2305_v12, %v2250_v9  ;;  %v2134_v35 = vrot.slane %v2133_v20, 2  ;;  %v2126_v41 = vadd.f32 %v2125_v31, %v2124_v15 }
 0x153   : > { %v3023_v18 = vpop.f32.mrf.mxu0 }
 0x154   : > { %v2377_v21 = vadd.f32 %v2371_v48, %v2311_v16  ;;  %v1348_v48 = vadd.f32 %v1347_v37, %v1346_v22  ;;  %v2127_v52 = vrot.slane %v2126_v41, 1 }
 0x155   : > { %v2308_v1 = vpop.f32.mrf.mxu0 }
 0x156   : > { %v2378_v23 = vadd.f32 %v3447_v26, %v2377_v21  ;;  %v2135_v26 = vadd.f32 %v2134_v35, %v2133_v20  ;;  %v1349_v61 = vadd.f32 %v1348_v48, %v3473_v29  ;;  %v2128_v0 = vadd.f32 %v2127_v52, %v2126_v41 }
 0x157   : > { %v3024_v33 = vpop.f32.mrf.mxu0 }
 0x158   : > { %vm2379_vm11 = vcmp.gt.f32.partialorder %v2378_v23, 0.0  ;;  %v2380_v36 = vmul.f32 0.01, %v2378_v23  ;;  %v2136_v58 = vrot.slane %v2135_v26, 1  ;;  %v1612_v4 = vadd.f32 %v1611_v56, %v1349_v61 }
 0x159   : > { %v2129_v9 = vadd.f32 %v2128_v0, %v1866_v5 }
 0x15a   : > { %v2381_v42 = vsel %vm2379_vm11, %v2378_v23, %v2380_v36  ;;  %v2137_v6 = vadd.f32 %v2136_v58, %v2135_v26  ;;  %v1875_v24 = vadd.f32 %v1874_v63, %v1612_v4 }
 0x15b   : > { %v2382_v30 = vpack.c.bf16 %v2381_v42, %v2381_v42  ;;  %v2385_v44 = vsel %vm543_vm4, %v2381_v42, 0.0  ;;  %v2393_v45 = vmul.f32 %v2381_v42, %v2381_v42 }
 0x15c   : > { %v2386_v47 = vrot.slane %v2385_v44, 4  ;;  %v2138_v29 = vadd.f32 %v2137_v6, %v1875_v24 }
 0x15d   : > { %2771 = vst.msk [vmem:[%s3454_s9 + $0x1c] sm:$0xf] %vm541_vm3, %v2382_v30  ;;  %v2394_v50 = vsel %vm543_vm4, %v2393_v45, 0.0 }
 0x15e   : > { %v2387_v53 = vadd.f32 %v2386_v47, %v2385_v44  ;;  %v2395_v54 = vrot.slane %v2394_v50, 4 }
 0x160   : > { %v2388_v59 = vrot.slane %v2387_v53, 2  ;;  %v2396_v60 = vadd.f32 %v2395_v54, %v2394_v50 }
 0x162   : > { %v2389_v2 = vadd.f32 %v2388_v59, %v2387_v53  ;;  %v2397_v3 = vrot.slane %v2396_v60, 2 }
 0x164   : > { %v2390_v7 = vrot.slane %v2389_v2, 1  ;;  %v2398_v8 = vadd.f32 %v2397_v3, %v2396_v60 }
 0x166   : > { %v2391_v10 = vadd.f32 %v2390_v7, %v2389_v2  ;;  %v2399_v11 = vrot.slane %v2398_v8, 1 }
 0x168   : > { %v2392_v12 = vadd.f32 %v2391_v10, %v2129_v9  ;;  %v2400_v13 = vadd.f32 %v2399_v11, %v2398_v8 }
 0x16a   : > { %v2401_v14 = vadd.f32 %v2400_v13, %v2138_v29  ;;  %2403 = vst.msk [vmem:[%s274_s12] sm:$0x1] %vm2402_vm12, %v2392_v12 }
 0x16c   : > { %2404 = vst.msk [vmem:[%s280_s15] sm:$0x1] %vm2402_vm12, %v2401_v14 }
 0x16d PF: > { %s16_s20 = sadd.s32 1, %s3128_s20   ;;  %s3531_s18 = smov %s3124_s19 }
 0x16e   : > { %p13_p5 = scmp.ge.s32.totalorder %s16_s20, 4   ;;  %s3532_s19 = smov %s3534_s21 }
 0x170   :  { %15 = sbr.rel (!%p13_p5) target bundleno = 2 (0x2), region = 105 }

</bundles_post_ra>
